<compile_context>
chip_gen: v6e
topology: v6e:2x2x1
jax: 0.10.0
libtpu: 0.0.40
codegen_flags: <defaults>
</compile_context>

<pallas_src>
import math
import jax
import jax.numpy as jnp
from jax.experimental import pallas as pl
from jax.experimental.pallas import tpu as pltpu


def _salayer_kernel(x_ref, wavg_ref, wmax_ref, b_ref, o_ref):
    # x_ref, o_ref      : (head, N, C) slab for one batch element
    # wavg_ref/wmax_ref : (N, N) dense conv matrices (constant index -> resident)
    # b_ref             : (1, 1) conv bias
    head, n, c = x_ref.shape
    inv_hc = 1.0 / float(head * c)

    # per-spatial-position mean / max over the (head, C) "channel" axes
    x0 = x_ref[0].astype(jnp.float32)                       # (N, C)
    s = jnp.sum(x0, axis=1, keepdims=True)                  # (N, 1)
    m = jnp.max(x0, axis=1, keepdims=True)                  # (N, 1)
    for h in range(1, head):
        xh = x_ref[h].astype(jnp.float32)
        s = s + jnp.sum(xh, axis=1, keepdims=True)
        m = jnp.maximum(m, jnp.max(xh, axis=1, keepdims=True))
    avg = s * inv_hc

    # 5x5 conv (padding=2) over the (patch, patch) map == two (N, N) matvecs
    z = (jnp.dot(wavg_ref[...], avg, preferred_element_type=jnp.float32)
         + jnp.dot(wmax_ref[...], m, preferred_element_type=jnp.float32)
         + b_ref[...])                                      # (N, 1)
    gate = 1.0 / (1.0 + jnp.exp(-z))                        # sigmoid (EUP exp)

    # out[h, p, c] = x[h, p, c] * gate[p]   (lane-broadcast of the gate)
    for h in range(head):
        o_ref[h] = (x_ref[h].astype(jnp.float32) * gate).astype(o_ref.dtype)


def _conv_as_matrices(conv_weight, patch):
    """Fold the 2->1 channel, 5x5, padding=2 conv into two dense (N, N) matrices.

    gate_flat = W_avg @ avg_flat + W_max @ max_flat + bias, with spatial
    positions flattened row-major (p = i*patch + j); zero padding is built in.
    """
    P = patch
    n = P * P
    w2 = conv_weight.reshape(2, 5, 5).astype(jnp.float32)
    pos = jnp.arange(n)
    pi = pos // P
    pj = pos % P
    # rows index the output position p, cols index the input position q
    u = pi[None, :] - pi[:, None] + 2                       # kernel row tap
    v = pj[None, :] - pj[:, None] + 2                       # kernel col tap
    valid = (u >= 0) & (u < 5) & (v >= 0) & (v < 5)
    uc = jnp.clip(u, 0, 4)
    vc = jnp.clip(v, 0, 4)
    w_avg = jnp.where(valid, w2[0][uc, vc], 0.0)
    w_max = jnp.where(valid, w2[1][uc, vc], 0.0)
    return w_avg, w_max


def salayer_forward(x, conv_weight, conv_bias, *, patch):
    """x: (B, head, N, C) with N == patch*patch; conv_weight: (1,2,5,5); conv_bias: (1,)."""
    b, head, n, c = x.shape
    assert n == patch * patch, "N must equal patch*patch"

    # NOTE: the dense conv matrices are (N, N) = patch^4 elements; fine for the
    # small spatial maps SALayer targets (patch <= ~32).
    w_avg, w_max = _conv_as_matrices(conv_weight, patch)
    bias2d = conv_bias.reshape(1, 1).astype(jnp.float32)

    return pl.pallas_call(
        _salayer_kernel,
        out_shape=jax.ShapeDtypeStruct((b, head, n, c), x.dtype),
        grid=(b,),
        in_specs=[
            pl.BlockSpec((None, head, n, c), lambda i: (i, 0, 0, 0)),  # x slab
            pl.BlockSpec((n, n), lambda i: (0, 0)),                    # W_avg (resident)
            pl.BlockSpec((n, n), lambda i: (0, 0)),                    # W_max (resident)
            pl.BlockSpec((1, 1), lambda i: (0, 0)),                    # bias
        ],
        out_specs=pl.BlockSpec((None, head, n, c), lambda i: (i, 0, 0, 0)),
        compiler_params=pltpu.CompilerParams(
            dimension_semantics=("parallel",),
            vmem_limit_bytes=32 * 1024 * 1024,
        ),
    )(x, w_avg, w_max, bias2d)


def salayer_ref(x, conv_weight, conv_bias, *, patch):
    """Pure-JAX reference mirroring the PyTorch module (explicit f32 conv taps)."""
    b, head, n, c = x.shape
    P = patch
    xm = jnp.swapaxes(x, 2, 3).reshape(b, head * c, P, P)
    avg = jnp.mean(xm, axis=1, keepdims=True)
    mx = jnp.max(xm, axis=1, keepdims=True)
    s = jnp.concatenate([avg, mx], axis=1)                  # (B, 2, P, P)
    sp = jnp.pad(s, ((0, 0), (0, 0), (2, 2), (2, 2)))
    gate = jnp.zeros((b, P, P), jnp.float32) + conv_bias[0]
    for ch in range(2):
        for u in range(5):
            for v in range(5):
                gate = gate + conv_weight[0, ch, u, v] * sp[:, ch, u:u + P, v:v + P]
    gate = jax.nn.sigmoid(gate)[:, None, :, :]
    xm = xm * gate
    return jnp.swapaxes(xm.reshape(b, head, c, n), 2, 3)


if __name__ == "__main__":
    patch = 16
    B, HEAD, C = 2, 2, 32
    N = patch * patch

    key = jax.random.PRNGKey(0)
    kx, kw, kb = jax.random.split(key, 3)
    x = jax.random.normal(kx, (B, HEAD, N, C), dtype=jnp.float32)

    # torch.nn.Conv2d(2, 1, 5) default init: U(-k, k), k = 1/sqrt(fan_in), fan_in = 2*5*5
    bound = 1.0 / math.sqrt(2 * 5 * 5)
    conv_w = jax.random.uniform(kw, (1, 2, 5, 5), jnp.float32, -bound, bound)
    conv_b = jax.random.uniform(kb, (1,), jnp.float32, -bound, bound)

    fwd = jax.jit(salayer_forward, static_argnames="patch")
    out = jax.block_until_ready(fwd(x, conv_w, conv_b, patch=patch))

    ref = salayer_ref(x, conv_w, conv_b, patch=patch)
    assert out.shape == (B, HEAD, N, C)
    # f32 end to end; tolerance leaves headroom for MXU f32-pass rounding + EUP sigmoid
    assert jnp.allclose(out, ref, atol=1e-3, rtol=1e-3), "mismatch vs reference"

    print("KERNEL_OK")
</pallas_src>

<mosaic_0001>
module attributes {stable_mosaic.version = 11 : i64} {
  func.func @_salayer_kernel(%arg0: i32, %arg1: memref<1x2x256x32xf32, #tpu.memory_space<vmem>>, %arg2: memref<256x256xf32, #tpu.memory_space<vmem>>, %arg3: memref<256x256xf32, #tpu.memory_space<vmem>>, %arg4: memref<1x1xf32, #tpu.memory_space<vmem>>, %arg5: memref<1x2x256x32xf32, #tpu.memory_space<vmem>>) attributes {dimension_semantics = [#tpu.dimension_semantics<parallel>], iteration_bounds = array<i64: 2>, scalar_prefetch = 0 : i64, scratch_operands = 0 : i64, tpu.core_type = #tpu.core_type<tc>, window_params = [{transform_indices = @transform_0, window_bounds = array<i64: 1, 2, 256, 32>}, {pipeline_mode = #tpu.pipeline_mode<synchronous>, transform_indices = @transform_1, window_bounds = array<i64: 256, 256>}, {pipeline_mode = #tpu.pipeline_mode<synchronous>, transform_indices = @transform_2, window_bounds = array<i64: 256, 256>}, {pipeline_mode = #tpu.pipeline_mode<synchronous>, transform_indices = @transform_3, window_bounds = array<i64: 1, 1>}, {transform_indices = @transform_4, window_bounds = array<i64: 1, 2, 256, 32>}]} {
    %c0 = arith.constant 0 : index
    %c0_0 = arith.constant 0 : index
    %c0_1 = arith.constant 0 : index
    %c0_2 = arith.constant 0 : index
    %0 = vector.load %arg1[%c0, %c0_0, %c0_1, %c0_2] : memref<1x2x256x32xf32, #tpu.memory_space<vmem>>, vector<1x1x256x32xf32>
    %1 = vector.shape_cast %0 : vector<1x1x256x32xf32> to vector<256x32xf32>
    %cst = arith.constant dense<0.000000e+00> : vector<256xf32>
    %2 = vector.multi_reduction <add>, %1, %cst [1] : vector<256x32xf32> to vector<256xf32>
    %3 = vector.shape_cast %2 : vector<256xf32> to vector<256x1xf32>
    %cst_3 = arith.constant dense<0xFF800000> : vector<256xf32>
    %4 = vector.multi_reduction <maximumf>, %1, %cst_3 [1] : vector<256x32xf32> to vector<256xf32>
    %5 = vector.shape_cast %4 : vector<256xf32> to vector<256x1xf32>
    %c0_4 = arith.constant 0 : index
    %c1 = arith.constant 1 : index
    %c0_5 = arith.constant 0 : index
    %c0_6 = arith.constant 0 : index
    %6 = vector.load %arg1[%c0_4, %c1, %c0_5, %c0_6] : memref<1x2x256x32xf32, #tpu.memory_space<vmem>>, vector<1x1x256x32xf32>
    %7 = vector.shape_cast %6 : vector<1x1x256x32xf32> to vector<256x32xf32>
    %cst_7 = arith.constant dense<0.000000e+00> : vector<256xf32>
    %8 = vector.multi_reduction <add>, %7, %cst_7 [1] : vector<256x32xf32> to vector<256xf32>
    %9 = vector.shape_cast %8 : vector<256xf32> to vector<256x1xf32>
    %10 = arith.addf %3, %9 : vector<256x1xf32>
    %cst_8 = arith.constant dense<0xFF800000> : vector<256xf32>
    %11 = vector.multi_reduction <maximumf>, %7, %cst_8 [1] : vector<256x32xf32> to vector<256xf32>
    %12 = vector.shape_cast %11 : vector<256xf32> to vector<256x1xf32>
    %13 = arith.maximumf %5, %12 : vector<256x1xf32>
    %cst_9 = arith.constant 1.562500e-02 : f32
    %14 = vector.broadcast %cst_9 : f32 to vector<256x1xf32>
    %15 = arith.mulf %10, %14 : vector<256x1xf32>
    %c0_10 = arith.constant 0 : index
    %c0_11 = arith.constant 0 : index
    %16 = vector.load %arg2[%c0_10, %c0_11] : memref<256x256xf32, #tpu.memory_space<vmem>>, vector<256x256xf32>
    %cst_12 = arith.constant dense<0.000000e+00> : vector<256x1xf32>
    %17 = tpu.matmul %16, %15, %cst_12 {dimension_numbers = #tpu.dot_dimension_numbers<[1], [0], [0], [1], [0, 0, 1, 1], [], []>} : vector<256x256xf32>, vector<256x1xf32>, vector<256x1xf32> -> vector<256x1xf32>
    %c0_13 = arith.constant 0 : index
    %c0_14 = arith.constant 0 : index
    %18 = vector.load %arg3[%c0_13, %c0_14] : memref<256x256xf32, #tpu.memory_space<vmem>>, vector<256x256xf32>
    %cst_15 = arith.constant dense<0.000000e+00> : vector<256x1xf32>
    %19 = tpu.matmul %18, %13, %cst_15 {dimension_numbers = #tpu.dot_dimension_numbers<[1], [0], [0], [1], [0, 0, 1, 1], [], []>} : vector<256x256xf32>, vector<256x1xf32>, vector<256x1xf32> -> vector<256x1xf32>
    %20 = arith.addf %17, %19 : vector<256x1xf32>
    %c0_16 = arith.constant 0 : index
    %c0_17 = arith.constant 0 : index
    %21 = vector.load %arg4[%c0_16, %c0_17] : memref<1x1xf32, #tpu.memory_space<vmem>>, vector<1x1xf32>
    %22 = vector.broadcast %21 : vector<1x1xf32> to vector<256x1xf32>
    %23 = arith.addf %20, %22 : vector<256x1xf32>
    %cst_18 = arith.constant 0.000000e+00 : f32
    %24 = vector.broadcast %cst_18 : f32 to vector<256x1xf32>
    %25 = arith.subf %24, %23 : vector<256x1xf32>
    %26 = math.exp %25 : vector<256x1xf32>
    %cst_19 = arith.constant 1.000000e+00 : f32
    %27 = vector.broadcast %cst_19 : f32 to vector<256x1xf32>
    %28 = arith.addf %27, %26 : vector<256x1xf32>
    %cst_20 = arith.constant 1.000000e+00 : f32
    %29 = vector.broadcast %cst_20 : f32 to vector<256x1xf32>
    %30 = arith.divf %29, %28 : vector<256x1xf32>
    %c0_21 = arith.constant 0 : index
    %c0_22 = arith.constant 0 : index
    %c0_23 = arith.constant 0 : index
    %c0_24 = arith.constant 0 : index
    %31 = vector.load %arg1[%c0_21, %c0_22, %c0_23, %c0_24] : memref<1x2x256x32xf32, #tpu.memory_space<vmem>>, vector<1x1x256x32xf32>
    %32 = vector.shape_cast %31 : vector<1x1x256x32xf32> to vector<256x32xf32>
    %33 = vector.broadcast %30 : vector<256x1xf32> to vector<256x32xf32>
    %34 = arith.mulf %32, %33 : vector<256x32xf32>
    %c0_25 = arith.constant 0 : index
    %c0_26 = arith.constant 0 : index
    %c0_27 = arith.constant 0 : index
    %c0_28 = arith.constant 0 : index
    %35 = vector.load %arg5[%c0_25, %c0_26, %c0_27, %c0_28] : memref<1x2x256x32xf32, #tpu.memory_space<vmem>>, vector<1x1x256x32xf32>
    %36 = vector.shape_cast %35 : vector<1x1x256x32xf32> to vector<256x32xf32>
    %37 = vector.shape_cast %34 : vector<256x32xf32> to vector<1x1x256x32xf32>
    tpu.vector_store %arg5[%c0_25, %c0_26, %c0_27, %c0_28], %37 {strides = array<i32>} : memref<1x2x256x32xf32, #tpu.memory_space<vmem>>, vector<1x1x256x32xf32>,
    %c0_29 = arith.constant 0 : index
    %c1_30 = arith.constant 1 : index
    %c0_31 = arith.constant 0 : index
    %c0_32 = arith.constant 0 : index
    %38 = vector.load %arg1[%c0_29, %c1_30, %c0_31, %c0_32] : memref<1x2x256x32xf32, #tpu.memory_space<vmem>>, vector<1x1x256x32xf32>
    %39 = vector.shape_cast %38 : vector<1x1x256x32xf32> to vector<256x32xf32>
    %40 = vector.broadcast %30 : vector<256x1xf32> to vector<256x32xf32>
    %41 = arith.mulf %39, %40 : vector<256x32xf32>
    %c0_33 = arith.constant 0 : index
    %c1_34 = arith.constant 1 : index
    %c0_35 = arith.constant 0 : index
    %c0_36 = arith.constant 0 : index
    %42 = vector.load %arg5[%c0_33, %c1_34, %c0_35, %c0_36] : memref<1x2x256x32xf32, #tpu.memory_space<vmem>>, vector<1x1x256x32xf32>
    %43 = vector.shape_cast %42 : vector<1x1x256x32xf32> to vector<256x32xf32>
    %44 = vector.shape_cast %41 : vector<256x32xf32> to vector<1x1x256x32xf32>
    tpu.vector_store %arg5[%c0_33, %c1_34, %c0_35, %c0_36], %44 {strides = array<i32>} : memref<1x2x256x32xf32, #tpu.memory_space<vmem>>, vector<1x1x256x32xf32>,
    return
  }
  func.func @transform_0(%arg0: i32) -> (i32, i32, i32, i32) {
    %c0_i32 = arith.constant 0 : i32
    %c0_i32_0 = arith.constant 0 : i32
    %c0_i32_1 = arith.constant 0 : i32
    %c0_i32_2 = arith.constant 0 : i32
    return %arg0, %c0_i32, %c0_i32_0, %c0_i32_1 : i32, i32, i32, i32
  }
  func.func @transform_1(%arg0: i32) -> (i32, i32) {
    %c0_i32 = arith.constant 0 : i32
    %c0_i32_0 = arith.constant 0 : i32
    %c0_i32_1 = arith.constant 0 : i32
    return %c0_i32, %c0_i32_0 : i32, i32
  }
  func.func @transform_2(%arg0: i32) -> (i32, i32) {
    %c0_i32 = arith.constant 0 : i32
    %c0_i32_0 = arith.constant 0 : i32
    %c0_i32_1 = arith.constant 0 : i32
    return %c0_i32, %c0_i32_0 : i32, i32
  }
  func.func @transform_3(%arg0: i32) -> (i32, i32) {
    %c0_i32 = arith.constant 0 : i32
    %c0_i32_0 = arith.constant 0 : i32
    %c0_i32_1 = arith.constant 0 : i32
    return %c0_i32, %c0_i32_0 : i32, i32
  }
  func.func @transform_4(%arg0: i32) -> (i32, i32, i32, i32) {
    %c0_i32 = arith.constant 0 : i32
    %c0_i32_0 = arith.constant 0 : i32
    %c0_i32_1 = arith.constant 0 : i32
    %c0_i32_2 = arith.constant 0 : i32
    return %arg0, %c0_i32, %c0_i32_0, %c0_i32_1 : i32, i32, i32, i32
  }
}

</mosaic_0001>

<bundles_post_ra>
// kernel: salayer_forward.1
= control target key start
LH: loop header
LB: loop body
LE: loop exit
PB: predicated region body
PF: predicated region fallthrough
CT: control target
= control target key end

     0   :  { %s2251_s17 = smov 0   ;;  %s3145_s0 = inlined_call_operand.vmem [shape: f32[2,2,256,32], index: 0, kind: input, shape index: {}]   ;;  %s3146_s1 = inlined_call_operand.vmem [shape: f32[256,256], index: 1, kind: input, shape index: {}]   ;;  %s3147_s2 = inlined_call_operand.vmem [shape: f32[256,256], index: 2, kind: input, shape index: {}]   ;;  %s3148_s3 = inlined_call_operand.<no memory space> [shape: f32[1,1], index: 3, kind: input, shape index: {}]   ;;  %s3149_s4 = inlined_call_operand.vmem [shape: f32[2,2,256,32], index: 4, kind: output, shape index: {}]  }
   0x1   :  { %v9_v0 = vstv %s3148_s3 }
   0x2   :  { %10 = vst [vmem:[#allocation2] sm:$0x1] %v9_v0 }
   0x3 LB: > { %s1931_s18 = sadd.s32 4294967295, %s2219_s17   ;;  %p1935_p0 = scmp.ge.s32.totalorder %s2219_s17, 1  ;;  %s2219_s17 = sphi %s2251_s17, %s16_s17  }
   0x4   : > { %p164_p1 = scmp.lt.s32.totalorder %s2219_s17, 3 }
   0x6   : > { %p165_p2 = pnand %p1935_p0, %p164_p1 }
   0x7   : > { %p190_p3 = scmp.lt.s32.totalorder (!%p165_p2), %s1931_s18, 1 }
   0x8   : > { %168 = sbr.rel (%p165_p2) target bundleno = 895 (0x37f), region = 36 }
   0xd   : > { %s3151_s18 = smov (!%p190_p3, %s1931_s18), 1  ;;  %vm232_vm0 = vcmask 261120   ;;  %v2221_v21 = vmov 0.0  }
   0xe   : > { %s2039_s3 = sshll.u32 %s3151_s18, 9  ;;  %1099 = vmatprep.subr.mxu1 %v2221_v21  ;;  %874 = vmatprep.subr.mxu0 %v2221_v21 }
   0xf   : > { %s2267_s21 = scalar_lea.vmem %s3145_s0, %s2039_s3  ;;  %s2949_s27 = scalar_lea.vmem %s3149_s4, %s2039_s3 }
  0x10   : > { %v215_v1 = vld [vmem:[%s2267_s21 + $0x78] sm:$0xff]  ;;  %v214_v2 = vld [vmem:[%s2267_s21 + $0x70] sm:$0xff]  ;;  %v213_v11 = vld [vmem:[%s2267_s21 + $0x68] sm:$0xff] }
  0x11   : > { %v1955_v3 = vld [vmem:[%s2267_s21 + $0x178] sm:$0xff]  ;;  %v278_v4 = vsel %vm232_vm0, %v215_v1, 0.0  ;;  %v275_v5 = vsel %vm232_vm0, %v214_v2, 0.0  ;;  %v374_v7 = vsel %vm232_vm0, %v215_v1, -inf  ;;  %v1954_v8 = vld [vmem:[%s2267_s21 + $0x170] sm:$0xff]  ;;  %v371_v12 = vsel %vm232_vm0, %v214_v2, -inf }
  0x12   : > { %279 = vadd.xlane.f32.xlu0 %v278_v4  ;;  %276 = vadd.xlane.f32.xlu1 %v275_v5  ;;  %v503_v6 = vsel %vm232_vm0, %v1955_v3, 0.0  ;;  %v500_v9 = vsel %vm232_vm0, %v1954_v8, 0.0  ;;  %v631_v10 = vsel %vm232_vm0, %v1955_v3, -inf  ;;  %v272_v13 = vsel %vm232_vm0, %v213_v11, 0.0  ;;  %v1953_v14 = vld [vmem:[%s2267_s21 + $0x168] sm:$0xff]  ;;  %v212_v17 = vld [vmem:[%s2267_s21 + $0x60] sm:$0xff] }
  0x13   : > { %v628_v15 = vsel %vm232_vm0, %v1954_v8, -inf  ;;  %v497_v16 = vsel %vm232_vm0, %v1953_v14, 0.0  ;;  %v368_v18 = vsel %vm232_vm0, %v213_v11, -inf  ;;  %v269_v19 = vsel %vm232_vm0, %v212_v17, 0.0  ;;  %v1952_v20 = vld [vmem:[%s2267_s21 + $0x160] sm:$0xff]  ;;  %v211_v24 = vld [vmem:[%s2267_s21 + $0x58] sm:$0xff] }
  0x14   : > { %v625_v22 = vsel %vm232_vm0, %v1953_v14, -inf  ;;  %v494_v23 = vsel %vm232_vm0, %v1952_v20, 0.0  ;;  %v365_v25 = vsel %vm232_vm0, %v212_v17, -inf  ;;  %v266_v26 = vsel %vm232_vm0, %v211_v24, 0.0  ;;  %v1951_v27 = vld [vmem:[%s2267_s21 + $0x158] sm:$0xff]  ;;  %v210_v30 = vld [vmem:[%s2267_s21 + $0x50] sm:$0xff] }
  0x15   : > { %v622_v28 = vsel %vm232_vm0, %v1952_v20, -inf  ;;  %v491_v29 = vsel %vm232_vm0, %v1951_v27, 0.0  ;;  %v362_v31 = vsel %vm232_vm0, %v211_v24, -inf  ;;  %v263_v32 = vsel %vm232_vm0, %v210_v30, 0.0  ;;  %v1950_v33 = vld [vmem:[%s2267_s21 + $0x150] sm:$0xff]  ;;  %v209_v36 = vld [vmem:[%s2267_s21 + $0x48] sm:$0xff] }
  0x16   : > { %504 = vadd.xlane.f32.xlu0 %v503_v6  ;;  %375 = vmax.xlane.f32.xlu1 %v374_v7  ;;  %v619_v34 = vsel %vm232_vm0, %v1951_v27, -inf  ;;  %v488_v35 = vsel %vm232_vm0, %v1950_v33, 0.0  ;;  %v359_v37 = vsel %vm232_vm0, %v210_v30, -inf  ;;  %v260_v38 = vsel %vm232_vm0, %v209_v36, 0.0  ;;  %v1949_v39 = vld [vmem:[%s2267_s21 + $0x148] sm:$0xff]  ;;  %v208_v42 = vld [vmem:[%s2267_s21 + $0x40] sm:$0xff] }
  0x17   : > { %v616_v40 = vsel %vm232_vm0, %v1950_v33, -inf  ;;  %v485_v41 = vsel %vm232_vm0, %v1949_v39, 0.0  ;;  %v356_v43 = vsel %vm232_vm0, %v209_v36, -inf  ;;  %v257_v44 = vsel %vm232_vm0, %v208_v42, 0.0  ;;  %v1948_v45 = vld [vmem:[%s2267_s21 + $0x140] sm:$0xff]  ;;  %v207_v48 = vld [vmem:[%s2267_s21 + $0x38] sm:$0xff] }
  0x18   : > { %v613_v46 = vsel %vm232_vm0, %v1949_v39, -inf  ;;  %v482_v47 = vsel %vm232_vm0, %v1948_v45, 0.0  ;;  %v353_v49 = vsel %vm232_vm0, %v208_v42, -inf  ;;  %v254_v50 = vsel %vm232_vm0, %v207_v48, 0.0  ;;  %v1947_v51 = vld [vmem:[%s2267_s21 + $0x138] sm:$0xff]  ;;  %v206_v54 = vld [vmem:[%s2267_s21 + $0x30] sm:$0xff] }
  0x19   : > { %v610_v52 = vsel %vm232_vm0, %v1948_v45, -inf  ;;  %v479_v53 = vsel %vm232_vm0, %v1947_v51, 0.0  ;;  %v350_v55 = vsel %vm232_vm0, %v207_v48, -inf  ;;  %v251_v56 = vsel %vm232_vm0, %v206_v54, 0.0  ;;  %v1946_v57 = vld [vmem:[%s2267_s21 + $0x130] sm:$0xff]  ;;  %v205_v60 = vld [vmem:[%s2267_s21 + $0x28] sm:$0xff] }
  0x1a   : > { %501 = vadd.xlane.f32.xlu0 %v500_v9  ;;  %632 = vmax.xlane.f32.xlu1 %v631_v10  ;;  %v607_v58 = vsel %vm232_vm0, %v1947_v51, -inf  ;;  %v476_v59 = vsel %vm232_vm0, %v1946_v57, 0.0  ;;  %v347_v61 = vsel %vm232_vm0, %v206_v54, -inf  ;;  %v248_v62 = vsel %vm232_vm0, %v205_v60, 0.0  ;;  %v1945_v63 = vld [vmem:[%s2267_s21 + $0x128] sm:$0xff]  ;;  %v204_v2 = vld [vmem:[%s2267_s21 + $0x20] sm:$0xff] }
  0x1b   : > { %v604_v0 = vsel %vm232_vm0, %v1946_v57, -inf  ;;  %v473_v1 = vsel %vm232_vm0, %v1945_v63, 0.0  ;;  %v344_v3 = vsel %vm232_vm0, %v205_v60, -inf  ;;  %v245_v4 = vsel %vm232_vm0, %v204_v2, 0.0  ;;  %v1944_v5 = vld [vmem:[%s2267_s21 + $0x120] sm:$0xff]  ;;  %v203_v8 = vld [vmem:[%s2267_s21 + $0x18] sm:$0xff] }
  0x1c   : > { %v601_v6 = vsel %vm232_vm0, %v1945_v63, -inf  ;;  %v470_v7 = vsel %vm232_vm0, %v1944_v5, 0.0  ;;  %v341_v9 = vsel %vm232_vm0, %v204_v2, -inf  ;;  %v242_v10 = vsel %vm232_vm0, %v203_v8, 0.0  ;;  %v1943_v11 = vld [vmem:[%s2267_s21 + $0x118] sm:$0xff]  ;;  %v202_v14 = vld [vmem:[%s2267_s21 + $0x10] sm:$0xff] }
  0x1d   : > { %v1942_v17 = vld [vmem:[%s2267_s21 + $0x110] sm:$0xff]  ;;  %v201_v20 = vld [vmem:[%s2267_s21 + $0x8] sm:$0xff]  ;;  %v200_v27 = vld [vmem:[%s2267_s21] sm:$0xff] }
  0x1e   : > { %372 = vmax.xlane.f32.xlu1 %v371_v12  ;;  %273 = vadd.xlane.f32.xlu0 %v272_v13  ;;  %v598_v12 = vsel %vm232_vm0, %v1944_v5, -inf  ;;  %v467_v13 = vsel %vm232_vm0, %v1943_v11, 0.0  ;;  %v1941_v24 = vld [vmem:[%s2267_s21 + $0x108] sm:$0xff]  ;;  %v1940_v30 = vld [vmem:[%s2267_s21 + $0x100] sm:$0xff]  ;;  %v231_v33 = vld [vmem:[%s2267_s21 + $0xf8] sm:$0xff] }
  0x1f   : > { %v1971_v36 = vld [vmem:[%s2267_s21 + $0x1f8] sm:$0xff]  ;;  %v230_v39 = vld [vmem:[%s2267_s21 + $0xf0] sm:$0xff]  ;;  %v229_v45 = vld [vmem:[%s2267_s21 + $0xe8] sm:$0xff] }
  0x20   : > { %v1970_v42 = vld [vmem:[%s2267_s21 + $0x1f0] sm:$0xff]  ;;  %v419_v48 = vsel %vm232_vm0, %v230_v39, -inf  ;;  %v416_v60 = vsel %vm232_vm0, %v229_v45, -inf }
  0x22   : > { %629 = vmax.xlane.f32.xlu1 %v628_v15  ;;  %498 = vadd.xlane.f32.xlu0 %v497_v16  ;;  %v338_v15 = vsel %vm232_vm0, %v203_v8, -inf  ;;  %v239_v16 = vsel %vm232_vm0, %v202_v14, 0.0 }
  0x26   : > { %369 = vmax.xlane.f32.xlu1 %v368_v18  ;;  %270 = vadd.xlane.f32.xlu0 %v269_v19  ;;  %v595_v18 = vsel %vm232_vm0, %v1943_v11, -inf  ;;  %v464_v19 = vsel %vm232_vm0, %v1942_v17, 0.0 }
  0x2a   : > { %626 = vmax.xlane.f32.xlu1 %v625_v22  ;;  %495 = vadd.xlane.f32.xlu0 %v494_v23  ;;  %v335_v22 = vsel %vm232_vm0, %v202_v14, -inf  ;;  %v236_v23 = vsel %vm232_vm0, %v201_v20, 0.0 }
  0x2e   : > { %366 = vmax.xlane.f32.xlu1 %v365_v25  ;;  %267 = vadd.xlane.f32.xlu0 %v266_v26  ;;  %v592_v25 = vsel %vm232_vm0, %v1942_v17, -inf  ;;  %v461_v26 = vsel %vm232_vm0, %v1941_v24, 0.0 }
  0x32   : > { %623 = vmax.xlane.f32.xlu1 %v622_v28  ;;  %492 = vadd.xlane.f32.xlu0 %v491_v29  ;;  %v332_v28 = vsel %vm232_vm0, %v201_v20, -inf  ;;  %v233_v29 = vsel %vm232_vm0, %v200_v27, 0.0 }
  0x36   : > { %363 = vmax.xlane.f32.xlu1 %v362_v31  ;;  %264 = vadd.xlane.f32.xlu0 %v263_v32  ;;  %v589_v31 = vsel %vm232_vm0, %v1941_v24, -inf  ;;  %v458_v32 = vsel %vm232_vm0, %v1940_v30, 0.0 }
  0x3a   : > { %620 = vmax.xlane.f32.xlu1 %v619_v34  ;;  %489 = vadd.xlane.f32.xlu0 %v488_v35  ;;  %v329_v34 = vsel %vm232_vm0, %v200_v27, -inf  ;;  %v326_v35 = vsel %vm232_vm0, %v231_v33, 0.0  ;;  %v1966_v27 = vld [vmem:[%s2267_s21 + $0x1d0] sm:$0xff] }
  0x3e   : > { %360 = vmax.xlane.f32.xlu1 %v359_v37  ;;  %261 = vadd.xlane.f32.xlu0 %v260_v38  ;;  %v586_v37 = vsel %vm232_vm0, %v1940_v30, -inf  ;;  %v551_v38 = vsel %vm232_vm0, %v1971_v36, 0.0 }
  0x42   : > { %617 = vmax.xlane.f32.xlu1 %v616_v40  ;;  %486 = vadd.xlane.f32.xlu0 %v485_v41  ;;  %v422_v40 = vsel %vm232_vm0, %v231_v33, -inf  ;;  %v323_v41 = vsel %vm232_vm0, %v230_v39, 0.0  ;;  %v225_v33 = vld [vmem:[%s2267_s21 + $0xc8] sm:$0xff] }
  0x43   : > { %v308_v39 = vsel %vm232_vm0, %v225_v33, 0.0 }
  0x46   : > { %357 = vmax.xlane.f32.xlu1 %v356_v43  ;;  %258 = vadd.xlane.f32.xlu0 %v257_v44  ;;  %v679_v43 = vsel %vm232_vm0, %v1971_v36, -inf  ;;  %v548_v44 = vsel %vm232_vm0, %v1970_v42, 0.0 }
  0x4a   : > { %614 = vmax.xlane.f32.xlu1 %v613_v46  ;;  %483 = vadd.xlane.f32.xlu0 %v482_v47 }
  0x4e   : > { %354 = vmax.xlane.f32.xlu1 %v353_v49  ;;  %255 = vadd.xlane.f32.xlu0 %v254_v50  ;;  %v320_v49 = vsel %vm232_vm0, %v229_v45, 0.0  ;;  %v1969_v50 = vld [vmem:[%s2267_s21 + $0x1e8] sm:$0xff] }
  0x4f   : > { %v545_v54 = vsel %vm232_vm0, %v1969_v50, 0.0 }
  0x52   : > { %611 = vmax.xlane.f32.xlu1 %v610_v52  ;;  %480 = vadd.xlane.f32.xlu0 %v479_v53  ;;  %v676_v53 = vsel %vm232_vm0, %v1970_v42, -inf }
  0x56   : > { %351 = vmax.xlane.f32.xlu1 %v350_v55  ;;  %252 = vadd.xlane.f32.xlu0 %v251_v56  ;;  %v228_v56 = vld [vmem:[%s2267_s21 + $0xe0] sm:$0xff] }
  0x57   : > { %v317_v63 = vsel %vm232_vm0, %v228_v56, 0.0 }
  0x5a   : > { %608 = vmax.xlane.f32.xlu1 %v607_v58  ;;  %477 = vadd.xlane.f32.xlu0 %v476_v59 }
  0x5e   : > { %348 = vmax.xlane.f32.xlu1 %v347_v61  ;;  %249 = vadd.xlane.f32.xlu0 %v248_v62 }
  0x62   : > { %605 = vmax.xlane.f32.xlu1 %v604_v0  ;;  %474 = vadd.xlane.f32.xlu0 %v473_v1  ;;  %v1968_v0 = vld [vmem:[%s2267_s21 + $0x1e0] sm:$0xff] }
  0x63   : > { %v542_v5 = vsel %vm232_vm0, %v1968_v0, 0.0  ;;  %v670_v17 = vsel %vm232_vm0, %v1968_v0, -inf }
  0x66   : > { %345 = vmax.xlane.f32.xlu1 %v344_v3  ;;  %246 = vadd.xlane.f32.xlu0 %v245_v4  ;;  %v673_v4 = vsel %vm232_vm0, %v1969_v50, -inf }
  0x6a   : > { %602 = vmax.xlane.f32.xlu1 %v601_v6  ;;  %471 = vadd.xlane.f32.xlu0 %v470_v7  ;;  %v227_v6 = vld [vmem:[%s2267_s21 + $0xd8] sm:$0xff] }
  0x6e   : > { %342 = vmax.xlane.f32.xlu1 %v341_v9  ;;  %243 = vadd.xlane.f32.xlu0 %v242_v10  ;;  %v413_v9 = vsel %vm232_vm0, %v228_v56, -inf }
  0x72   : > { %599 = vmax.xlane.f32.xlu1 %v598_v12  ;;  %468 = vadd.xlane.f32.xlu0 %v467_v13  ;;  %v314_v12 = vsel %vm232_vm0, %v227_v6, 0.0  ;;  %v1967_v13 = vld [vmem:[%s2267_s21 + $0x1d8] sm:$0xff] }
  0x76   : > { %339 = vmax.xlane.f32.xlu1 %v338_v15  ;;  %240 = vadd.xlane.f32.xlu0 %v239_v16 }
  0x7a   : > { %596 = vmax.xlane.f32.xlu1 %v595_v18  ;;  %465 = vadd.xlane.f32.xlu0 %v464_v19  ;;  %v539_v18 = vsel %vm232_vm0, %v1967_v13, 0.0  ;;  %v226_v19 = vld [vmem:[%s2267_s21 + $0xd0] sm:$0xff] }
  0x7b   : > { %v407_v36 = vsel %vm232_vm0, %v226_v19, -inf }
  0x7e   : > { %336 = vmax.xlane.f32.xlu1 %v335_v22  ;;  %237 = vadd.xlane.f32.xlu0 %v236_v23  ;;  %v410_v23 = vsel %vm232_vm0, %v227_v6, -inf }
  0x82   : > { %593 = vmax.xlane.f32.xlu1 %v592_v25  ;;  %462 = vadd.xlane.f32.xlu0 %v461_v26  ;;  %v311_v26 = vsel %vm232_vm0, %v226_v19, 0.0 }
  0x86   : > { %333 = vmax.xlane.f32.xlu1 %v332_v28  ;;  %234 = vadd.xlane.f32.xlu0 %v233_v29 }
  0x8a   : > { %590 = vmax.xlane.f32.xlu1 %v589_v31  ;;  %459 = vadd.xlane.f32.xlu0 %v458_v32  ;;  %v667_v31 = vsel %vm232_vm0, %v1967_v13, -inf  ;;  %v536_v32 = vsel %vm232_vm0, %v1966_v27, 0.0 }
  0x8e   : > { %330 = vmax.xlane.f32.xlu1 %v329_v34  ;;  %327 = vadd.xlane.f32.xlu0 %v326_v35 }
  0x92   : > { %587 = vmax.xlane.f32.xlu1 %v586_v37  ;;  %552 = vadd.xlane.f32.xlu0 %v551_v38 }
  0x96   : > { %423 = vmax.xlane.f32.xlu1 %v422_v40  ;;  %324 = vadd.xlane.f32.xlu0 %v323_v41  ;;  %v1965_v40 = vld [vmem:[%s2267_s21 + $0x1c8] sm:$0xff] }
  0x97   : > { %v533_v45 = vsel %vm232_vm0, %v1965_v40, 0.0 }
  0x9a   : > { %680 = vmax.xlane.f32.xlu1 %v679_v43  ;;  %549 = vadd.xlane.f32.xlu0 %v548_v44  ;;  %v664_v44 = vsel %vm232_vm0, %v1966_v27, -inf }
  0x9b   : > { %v280_v46 = vpop.xlane.xlu0 %279  ;;  %v277_v47 = vpop.xlane.xlu1 %276 }
  0x9e   : > { %420 = vmax.xlane.f32.xlu1 %v419_v48  ;;  %321 = vadd.xlane.f32.xlu0 %v320_v49  ;;  %v404_v49 = vsel %vm232_vm0, %v225_v33, -inf }
  0x9f   : > { %v505_v51 = vpop.xlane.xlu0 %504  ;;  %v376_v52 = vpop.xlane.xlu1 %375 }
  0xa0   : > { %v569_v55 = vadd.f32 %v505_v51, %v280_v46  ;;  %v224_v46 = vld [vmem:[%s2267_s21 + $0xc0] sm:$0xff] }
  0xa2   : > { %677 = vmax.xlane.f32.xlu1 %v676_v53  ;;  %546 = vadd.xlane.f32.xlu0 %v545_v54  ;;  %v729_v57 = vmul.f32 0.015625, %v569_v55  ;;  %v1964_v53 = vld [vmem:[%s2267_s21 + $0x1c0] sm:$0xff] }
  0xa3   : > { %v502_v58 = vpop.xlane.xlu0 %501  ;;  %v633_v59 = vpop.xlane.xlu1 %632  ;;  %v658_v6 = vsel %vm232_vm0, %v1964_v53, -inf }
  0xa4   : > { %v568_v61 = vadd.f32 %v502_v58, %v277_v47  ;;  %1100 = vmatpush1.msra.mxu1 %v729_v57  ;;  %v697_v62 = vmax.f32 %v376_v52, %v633_v59  ;;  %v305_v52 = vsel %vm232_vm0, %v224_v46, 0.0  ;;  %v661_v57 = vsel %vm232_vm0, %v1965_v40, -inf  ;;  %v223_v59 = vld [vmem:[%s2267_s21 + $0xb8] sm:$0xff] }
  0xa5   : > { %1101 = vmatprep.subr.mxu1 %v2221_v21  ;;  %v530_v58 = vsel %vm232_vm0, %v1964_v53, 0.0 }
  0xa6   : > { %v728_v1 = vmul.f32 0.015625, %v568_v61  ;;  %875 = vmatpush1.msra.mxu0 %v697_v62  ;;  %417 = vmax.xlane.f32.xlu1 %v416_v60  ;;  %v401_v62 = vsel %vm232_vm0, %v224_v46, -inf }
  0xa7   : > { %318 = vadd.xlane.f32.xlu0 %v317_v63  ;;  %v373_v2 = vpop.xlane.xlu1 %372  ;;  %v274_v3 = vpop.xlane.xlu0 %273  ;;  %876 = vmatprep.subr.mxu0 %v2221_v21 }
  0xa8   : > { %1102 = vmatpush1.msra.mxu1 %v728_v1  ;;  %v302_v1 = vsel %vm232_vm0, %v223_v59, 0.0 }
  0xa9   : > { %1103 = vmatprep.subr.mxu1 %v2221_v21 }
  0xaa   : > { %674 = vmax.xlane.f32.xlu1 %v673_v4 }
  0xab   : > { %543 = vadd.xlane.f32.xlu0 %v542_v5  ;;  %v630_v7 = vpop.xlane.xlu1 %629  ;;  %v499_v8 = vpop.xlane.xlu0 %498 }
  0xac   : > { %v696_v10 = vmax.f32 %v373_v2, %v630_v7  ;;  %v567_v11 = vadd.f32 %v499_v8, %v274_v3  ;;  %v1963_v2 = vld [vmem:[%s2267_s21 + $0x1b8] sm:$0xff]  ;;  %v222_v8 = vld [vmem:[%s2267_s21 + $0xb0] sm:$0xff] }
  0xad   : > { %v527_v7 = vsel %vm232_vm0, %v1963_v2, 0.0  ;;  %v655_v19 = vsel %vm232_vm0, %v1963_v2, -inf }
  0xae   : > { %v727_v14 = vmul.f32 0.015625, %v567_v11  ;;  %877 = vmatpush1.msra.mxu0 %v696_v10  ;;  %414 = vmax.xlane.f32.xlu1 %v413_v9  ;;  %v398_v11 = vsel %vm232_vm0, %v223_v59, -inf }
  0xaf   : > { %315 = vadd.xlane.f32.xlu0 %v314_v12  ;;  %v370_v15 = vpop.xlane.xlu1 %369  ;;  %v271_v16 = vpop.xlane.xlu0 %270  ;;  %878 = vmatprep.subr.mxu0 %v2221_v21 }
  0xb0   : > { %1104 = vmatpush1.msra.mxu1 %v727_v14  ;;  %v299_v14 = vsel %vm232_vm0, %v222_v8, 0.0 }
  0xb1   : > { %1105 = vmatprep.subr.mxu1 %v2221_v21 }
  0xb2   : > { %671 = vmax.xlane.f32.xlu1 %v670_v17 }
  0xb3   : > { %540 = vadd.xlane.f32.xlu0 %v539_v18  ;;  %v627_v20 = vpop.xlane.xlu1 %626  ;;  %v496_v22 = vpop.xlane.xlu0 %495 }
  0xb4   : > { %v695_v24 = vmax.f32 %v370_v15, %v627_v20  ;;  %v566_v25 = vadd.f32 %v496_v22, %v271_v16  ;;  %v1962_v15 = vld [vmem:[%s2267_s21 + $0x1b0] sm:$0xff]  ;;  %v221_v22 = vld [vmem:[%s2267_s21 + $0xa8] sm:$0xff] }
  0xb5   : > { %v524_v20 = vsel %vm232_vm0, %v1962_v15, 0.0  ;;  %v652_v33 = vsel %vm232_vm0, %v1962_v15, -inf }
  0xb6   : > { %v726_v28 = vmul.f32 0.015625, %v566_v25  ;;  %879 = vmatpush1.msra.mxu0 %v695_v24  ;;  %411 = vmax.xlane.f32.xlu1 %v410_v23  ;;  %v395_v25 = vsel %vm232_vm0, %v222_v8, -inf }
  0xb7   : > { %312 = vadd.xlane.f32.xlu0 %v311_v26  ;;  %v367_v29 = vpop.xlane.xlu1 %366  ;;  %v268_v30 = vpop.xlane.xlu0 %267  ;;  %880 = vmatprep.subr.mxu0 %v2221_v21 }
  0xb8   : > { %1106 = vmatpush1.msra.mxu1 %v726_v28  ;;  %v296_v28 = vsel %vm232_vm0, %v221_v22, 0.0 }
  0xb9   : > { %1107 = vmatprep.subr.mxu1 %v2221_v21 }
  0xba   : > { %668 = vmax.xlane.f32.xlu1 %v667_v31 }
  0xbb   : > { %537 = vadd.xlane.f32.xlu0 %v536_v32  ;;  %v624_v34 = vpop.xlane.xlu1 %623  ;;  %v493_v35 = vpop.xlane.xlu0 %492 }
  0xbc   : > { %v694_v37 = vmax.f32 %v367_v29, %v624_v34  ;;  %v565_v38 = vadd.f32 %v493_v35, %v268_v30  ;;  %v1961_v29 = vld [vmem:[%s2267_s21 + $0x1a8] sm:$0xff]  ;;  %v220_v35 = vld [vmem:[%s2267_s21 + $0xa0] sm:$0xff] }
  0xbd   : > { %v521_v34 = vsel %vm232_vm0, %v1961_v29, 0.0  ;;  %v649_v46 = vsel %vm232_vm0, %v1961_v29, -inf }
  0xbe   : > { %v725_v41 = vmul.f32 0.015625, %v565_v38  ;;  %881 = vmatpush1.msra.mxu0 %v694_v37  ;;  %408 = vmax.xlane.f32.xlu1 %v407_v36  ;;  %v392_v38 = vsel %vm232_vm0, %v221_v22, -inf }
  0xbf   : > { %309 = vadd.xlane.f32.xlu0 %v308_v39  ;;  %v364_v42 = vpop.xlane.xlu1 %363  ;;  %v265_v43 = vpop.xlane.xlu0 %264  ;;  %882 = vmatprep.subr.mxu0 %v2221_v21 }
  0xc0   : > { %1108 = vmatpush1.msra.mxu1 %v725_v41  ;;  %v293_v41 = vsel %vm232_vm0, %v220_v35, 0.0 }
  0xc1   : > { %1109 = vmatprep.subr.mxu1 %v2221_v21 }
  0xc2   : > { %665 = vmax.xlane.f32.xlu1 %v664_v44 }
  0xc3   : > { %534 = vadd.xlane.f32.xlu0 %v533_v45  ;;  %v621_v47 = vpop.xlane.xlu1 %620  ;;  %v490_v48 = vpop.xlane.xlu0 %489 }
  0xc4   : > { %v693_v50 = vmax.f32 %v364_v42, %v621_v47  ;;  %v564_v51 = vadd.f32 %v490_v48, %v265_v43  ;;  %v1960_v42 = vld [vmem:[%s2267_s21 + $0x1a0] sm:$0xff]  ;;  %v219_v48 = vld [vmem:[%s2267_s21 + $0x98] sm:$0xff] }
  0xc5   : > { %v518_v47 = vsel %vm232_vm0, %v1960_v42, 0.0  ;;  %v646_v59 = vsel %vm232_vm0, %v1960_v42, -inf }
  0xc6   : > { %v724_v54 = vmul.f32 0.015625, %v564_v51  ;;  %883 = vmatpush1.msra.mxu0 %v693_v50  ;;  %405 = vmax.xlane.f32.xlu1 %v404_v49  ;;  %v389_v51 = vsel %vm232_vm0, %v220_v35, -inf }
  0xc7   : > { %306 = vadd.xlane.f32.xlu0 %v305_v52  ;;  %v361_v55 = vpop.xlane.xlu1 %360  ;;  %v262_v56 = vpop.xlane.xlu0 %261  ;;  %884 = vmatprep.subr.mxu0 %v2221_v21 }
  0xc8   : > { %1110 = vmatpush1.msra.mxu1 %v724_v54  ;;  %v290_v54 = vsel %vm232_vm0, %v219_v48, 0.0 }
  0xc9   : > { %1111 = vmatprep.subr.mxu1 %v2221_v21 }
  0xca   : > { %662 = vmax.xlane.f32.xlu1 %v661_v57 }
  0xcb   : > { %531 = vadd.xlane.f32.xlu0 %v530_v58  ;;  %v618_v60 = vpop.xlane.xlu1 %617  ;;  %v487_v61 = vpop.xlane.xlu0 %486 }
  0xcc   : > { %v692_v63 = vmax.f32 %v361_v55, %v618_v60  ;;  %v563_v0 = vadd.f32 %v487_v61, %v262_v56  ;;  %v1959_v55 = vld [vmem:[%s2267_s21 + $0x198] sm:$0xff]  ;;  %v218_v61 = vld [vmem:[%s2267_s21 + $0x90] sm:$0xff] }
  0xcd   : > { %v515_v60 = vsel %vm232_vm0, %v1959_v55, 0.0  ;;  %v643_v8 = vsel %vm232_vm0, %v1959_v55, -inf }
  0xce   : > { %v723_v3 = vmul.f32 0.015625, %v563_v0  ;;  %885 = vmatpush1.msra.mxu0 %v692_v63  ;;  %402 = vmax.xlane.f32.xlu1 %v401_v62  ;;  %v386_v0 = vsel %vm232_vm0, %v219_v48, -inf }
  0xcf   : > { %303 = vadd.xlane.f32.xlu0 %v302_v1  ;;  %v358_v4 = vpop.xlane.xlu1 %357  ;;  %v259_v5 = vpop.xlane.xlu0 %258  ;;  %886 = vmatprep.subr.mxu0 %v2221_v21 }
  0xd0   : > { %1112 = vmatpush1.msra.mxu1 %v723_v3  ;;  %v287_v3 = vsel %vm232_vm0, %v218_v61, 0.0 }
  0xd1   : > { %1113 = vmatprep.subr.mxu1 %v2221_v21 }
  0xd2   : > { %659 = vmax.xlane.f32.xlu1 %v658_v6 }
  0xd3   : > { %528 = vadd.xlane.f32.xlu0 %v527_v7  ;;  %v615_v9 = vpop.xlane.xlu1 %614  ;;  %v484_v10 = vpop.xlane.xlu0 %483 }
  0xd4   : > { %v691_v12 = vmax.f32 %v358_v4, %v615_v9  ;;  %v562_v13 = vadd.f32 %v484_v10, %v259_v5  ;;  %v1958_v4 = vld [vmem:[%s2267_s21 + $0x190] sm:$0xff]  ;;  %v217_v10 = vld [vmem:[%s2267_s21 + $0x88] sm:$0xff] }
  0xd5   : > { %v512_v9 = vsel %vm232_vm0, %v1958_v4, 0.0  ;;  %v640_v22 = vsel %vm232_vm0, %v1958_v4, -inf }
  0xd6   : > { %v722_v16 = vmul.f32 0.015625, %v562_v13  ;;  %887 = vmatpush1.msra.mxu0 %v691_v12  ;;  %399 = vmax.xlane.f32.xlu1 %v398_v11  ;;  %v383_v13 = vsel %vm232_vm0, %v218_v61, -inf }
  0xd7   : > { %300 = vadd.xlane.f32.xlu0 %v299_v14  ;;  %v355_v17 = vpop.xlane.xlu1 %354  ;;  %v256_v18 = vpop.xlane.xlu0 %255  ;;  %888 = vmatprep.subr.mxu0 %v2221_v21 }
  0xd8   : > { %1114 = vmatpush1.msra.mxu1 %v722_v16  ;;  %v284_v16 = vsel %vm232_vm0, %v217_v10, 0.0 }
  0xd9   : > { %1115 = vmatprep.subr.mxu1 %v2221_v21 }
  0xda   : > { %656 = vmax.xlane.f32.xlu1 %v655_v19 }
  0xdb   : > { %525 = vadd.xlane.f32.xlu0 %v524_v20  ;;  %v612_v23 = vpop.xlane.xlu1 %611  ;;  %v481_v24 = vpop.xlane.xlu0 %480 }
  0xdc   : > { %v690_v26 = vmax.f32 %v355_v17, %v612_v23  ;;  %v561_v27 = vadd.f32 %v481_v24, %v256_v18  ;;  %v1957_v17 = vld [vmem:[%s2267_s21 + $0x188] sm:$0xff]  ;;  %v216_v24 = vld [vmem:[%s2267_s21 + $0x80] sm:$0xff] }
  0xdd   : > { %v509_v23 = vsel %vm232_vm0, %v1957_v17, 0.0  ;;  %v637_v35 = vsel %vm232_vm0, %v1957_v17, -inf  ;;  %v377_v42 = vsel %vm232_vm0, %v216_v24, -inf }
  0xde   : > { %v721_v30 = vmul.f32 0.015625, %v561_v27  ;;  %889 = vmatpush1.msra.mxu0 %v690_v26  ;;  %396 = vmax.xlane.f32.xlu1 %v395_v25  ;;  %v380_v27 = vsel %vm232_vm0, %v217_v10, -inf }
  0xdf   : > { %297 = vadd.xlane.f32.xlu0 %v296_v28  ;;  %v352_v31 = vpop.xlane.xlu1 %351  ;;  %v253_v32 = vpop.xlane.xlu0 %252  ;;  %890 = vmatprep.subr.mxu0 %v2221_v21 }
  0xe0   : > { %1116 = vmatpush1.msra.mxu1 %v721_v30  ;;  %v281_v30 = vsel %vm232_vm0, %v216_v24, 0.0 }
  0xe1   : > { %1117 = vmatprep.subr.mxu1 %v2221_v21 }
  0xe2   : > { %653 = vmax.xlane.f32.xlu1 %v652_v33 }
  0xe3   : > { %522 = vadd.xlane.f32.xlu0 %v521_v34  ;;  %v609_v36 = vpop.xlane.xlu1 %608  ;;  %v478_v37 = vpop.xlane.xlu0 %477 }
  0xe4   : > { %v689_v39 = vmax.f32 %v352_v31, %v609_v36  ;;  %v560_v40 = vadd.f32 %v478_v37, %v253_v32  ;;  %v1956_v31 = vld [vmem:[%s2267_s21 + $0x180] sm:$0xff] }
  0xe5   : > { %v506_v36 = vsel %vm232_vm0, %v1956_v31, 0.0 }
  0xe6   : > { %v720_v43 = vmul.f32 0.015625, %v560_v40  ;;  %891 = vmatpush1.msra.mxu0 %v689_v39  ;;  %393 = vmax.xlane.f32.xlu1 %v392_v38  ;;  %v634_v39 = vsel %vm232_vm0, %v1956_v31, -inf }
  0xe7   : > { %294 = vadd.xlane.f32.xlu0 %v293_v41  ;;  %v349_v44 = vpop.xlane.xlu1 %348  ;;  %v250_v45 = vpop.xlane.xlu0 %249  ;;  %892 = vmatprep.subr.mxu0 %v2221_v21 }
  0xe8   : > { %1118 = vmatpush1.msra.mxu1 %v720_v43 }
  0xe9   : > { %1119 = vmatprep.subr.mxu1 %v2221_v21 }
  0xea   : > { %650 = vmax.xlane.f32.xlu1 %v649_v46 }
  0xeb   : > { %519 = vadd.xlane.f32.xlu0 %v518_v47  ;;  %v606_v49 = vpop.xlane.xlu1 %605  ;;  %v475_v50 = vpop.xlane.xlu0 %474 }
  0xec   : > { %v688_v52 = vmax.f32 %v349_v44, %v606_v49  ;;  %v559_v53 = vadd.f32 %v475_v50, %v250_v45 }
  0xee   : > { %v719_v56 = vmul.f32 0.015625, %v559_v53  ;;  %893 = vmatpush1.msra.mxu0 %v688_v52  ;;  %390 = vmax.xlane.f32.xlu1 %v389_v51  ;;  %v747_v53 = vld [vmem:[%s3146_s1 + $0x8] sm:$0xff] }
  0xef   : > { %291 = vadd.xlane.f32.xlu0 %v290_v54  ;;  %v346_v57 = vpop.xlane.xlu1 %345  ;;  %v247_v58 = vpop.xlane.xlu0 %246  ;;  %894 = vmatprep.subr.mxu0 %v2221_v21  ;;  %v811_v54 = vld [vmem:[%s3147_s2 + $0x8] sm:$0xff] }
  0xf0   : > { %1120 = vmatpush1.msra.mxu1 %v719_v56  ;;  %1163 = vmatprep.mubr.f32.mxu1 %v747_v53 }
  0xf1   : > { %1121 = vmatprep.subr.mxu1 %v2221_v21  ;;  %938 = vmatprep.mubr.f32.mxu0 %v811_v54 }
  0xf2   : > { %647 = vmax.xlane.f32.xlu1 %v646_v59 }
  0xf3   : > { %516 = vadd.xlane.f32.xlu0 %v515_v60  ;;  %v603_v62 = vpop.xlane.xlu1 %602  ;;  %v472_v63 = vpop.xlane.xlu0 %471 }
  0xf4   : > { %v687_v1 = vmax.f32 %v346_v57, %v603_v62  ;;  %v558_v2 = vadd.f32 %v472_v63, %v247_v58 }
  0xf6   : > { %v718_v5 = vmul.f32 0.015625, %v558_v2  ;;  %895 = vmatpush1.msra.mxu0 %v687_v1  ;;  %387 = vmax.xlane.f32.xlu1 %v386_v0 }
  0xf7   : > { %288 = vadd.xlane.f32.xlu0 %v287_v3  ;;  %v343_v6 = vpop.xlane.xlu1 %342  ;;  %v244_v7 = vpop.xlane.xlu0 %243  ;;  %896 = vmatprep.subr.mxu0 %v2221_v21 }
  0xf8   : > { %1122 = vmatpush1.msra.mxu1 %v718_v5 }
  0xf9   : > { %1123 = vmatprep.subr.mxu1 %v2221_v21 }
  0xfa   : > { %644 = vmax.xlane.f32.xlu1 %v643_v8 }
  0xfb   : > { %513 = vadd.xlane.f32.xlu0 %v512_v9  ;;  %v600_v11 = vpop.xlane.xlu1 %599  ;;  %v469_v12 = vpop.xlane.xlu0 %468 }
  0xfc   : > { %v686_v14 = vmax.f32 %v343_v6, %v600_v11  ;;  %v557_v15 = vadd.f32 %v469_v12, %v244_v7 }
  0xfe   : > { %v717_v18 = vmul.f32 0.015625, %v557_v15  ;;  %897 = vmatpush1.msra.mxu0 %v686_v14  ;;  %384 = vmax.xlane.f32.xlu1 %v383_v13 }
  0xff   : > { %285 = vadd.xlane.f32.xlu0 %v284_v16  ;;  %v340_v19 = vpop.xlane.xlu1 %339  ;;  %v241_v20 = vpop.xlane.xlu0 %240  ;;  %898 = vmatprep.subr.mxu0 %v2221_v21 }
 0x100   : > { %1124 = vmatpush1.msra.mxu1 %v717_v18 }
 0x101   : > { %1125 = vmatprep.subr.mxu1 %v2221_v21 }
 0x102   : > { %641 = vmax.xlane.f32.xlu1 %v640_v22 }
 0x103   : > { %510 = vadd.xlane.f32.xlu0 %v509_v23  ;;  %v597_v25 = vpop.xlane.xlu1 %596  ;;  %v466_v26 = vpop.xlane.xlu0 %465 }
 0x104   : > { %v685_v28 = vmax.f32 %v340_v19, %v597_v25  ;;  %v556_v29 = vadd.f32 %v466_v26, %v241_v20 }
 0x106   : > { %v716_v32 = vmul.f32 0.015625, %v556_v29  ;;  %899 = vmatpush1.msra.mxu0 %v685_v28  ;;  %381 = vmax.xlane.f32.xlu1 %v380_v27 }
 0x107   : > { %282 = vadd.xlane.f32.xlu0 %v281_v30  ;;  %v337_v33 = vpop.xlane.xlu1 %336  ;;  %v238_v34 = vpop.xlane.xlu0 %237  ;;  %900 = vmatprep.subr.mxu0 %v2221_v21 }
 0x108   : > { %1126 = vmatpush1.msra.mxu1 %v716_v32 }
 0x109   : > { %1127 = vmatprep.subr.mxu1 %v2221_v21 }
 0x10a   : > { %638 = vmax.xlane.f32.xlu1 %v637_v35 }
 0x10b   : > { %507 = vadd.xlane.f32.xlu0 %v506_v36  ;;  %v594_v37 = vpop.xlane.xlu1 %593  ;;  %v463_v38 = vpop.xlane.xlu0 %462 }
 0x10c   : > { %v684_v40 = vmax.f32 %v337_v33, %v594_v37  ;;  %v555_v41 = vadd.f32 %v463_v38, %v238_v34 }
 0x10e   : > { %v715_v43 = vmul.f32 0.015625, %v555_v41  ;;  %901 = vmatpush1.msra.mxu0 %v684_v40  ;;  %635 = vmax.xlane.f32.xlu1 %v634_v39 }
 0x10f   : > { %378 = vmax.xlane.f32.xlu0 %v377_v42  ;;  %v334_v44 = vpop.xlane.xlu1 %333  ;;  %v235_v45 = vpop.xlane.xlu0 %234  ;;  %902 = vmatprep.subr.mxu0 %v2221_v21 }
 0x110   : > { %1128 = vmatpush1.msra.mxu1 %v715_v43 }
 0x111   : > { %1129 = vmatprep.subr.mxu1 %v2221_v21 }
 0x113   : > { %v591_v46 = vpop.xlane.xlu1 %590  ;;  %v460_v47 = vpop.xlane.xlu0 %459 }
 0x114   : > { %v683_v48 = vmax.f32 %v334_v44, %v591_v46  ;;  %v554_v49 = vadd.f32 %v460_v47, %v235_v45 }
 0x116   : > { %v714_v50 = vmul.f32 0.015625, %v554_v49  ;;  %903 = vmatpush1.msra.mxu0 %v683_v48 }
 0x117   : > { %v331_v51 = vpop.xlane.xlu1 %330  ;;  %v328_v52 = vpop.xlane.xlu0 %327  ;;  %904 = vmatprep.subr.mxu0 %v2221_v21 }
 0x118   : > { %1130 = vmatpush1.msra.mxu1 %v714_v50 }
 0x119   : > { %1131 = vmatprep.subr.mxu1 %v2221_v21 }
 0x11b   : > { %v588_v55 = vpop.xlane.xlu1 %587  ;;  %v553_v56 = vpop.xlane.xlu0 %552 }
 0x11c   : > { %v682_v57 = vmax.f32 %v331_v51, %v588_v55  ;;  %v585_v58 = vadd.f32 %v553_v56, %v328_v52 }
 0x11e   : > { %v745_v59 = vmul.f32 0.015625, %v585_v58  ;;  %905 = vmatpush1.msra.mxu0 %v682_v57 }
 0x11f   : > { %v424_v60 = vpop.xlane.xlu1 %423  ;;  %v325_v61 = vpop.xlane.xlu0 %324  ;;  %906 = vmatprep.subr.mxu0 %v2221_v21 }
 0x120   : > { %1132 = vmatpush2.msra.mxu1 %v745_v59 }
 0x121   : > { %1133 = vmatprep.subr.mxu1 %v2221_v21 }
 0x123   : > { %v681_v62 = vpop.xlane.xlu1 %680  ;;  %v550_v63 = vpop.xlane.xlu0 %549 }
 0x124   : > { %v713_v0 = vmax.f32 %v424_v60, %v681_v62  ;;  %v584_v1 = vadd.f32 %v550_v63, %v325_v61 }
 0x126   : > { %v744_v2 = vmul.f32 0.015625, %v584_v1  ;;  %907 = vmatpush2.msra.mxu0 %v713_v0 }
 0x127   : > { %v421_v3 = vpop.xlane.xlu1 %420  ;;  %v322_v4 = vpop.xlane.xlu0 %321  ;;  %908 = vmatprep.subr.mxu0 %v2221_v21 }
 0x128   : > { %1134 = vmatpush2.msra.mxu1 %v744_v2 }
 0x129   : > { %1135 = vmatprep.subr.mxu1 %v2221_v21 }
 0x12b   : > { %v678_v5 = vpop.xlane.xlu1 %677  ;;  %v547_v6 = vpop.xlane.xlu0 %546 }
 0x12c   : > { %v712_v7 = vmax.f32 %v421_v3, %v678_v5  ;;  %v583_v8 = vadd.f32 %v547_v6, %v322_v4 }
 0x12e   : > { %v743_v9 = vmul.f32 0.015625, %v583_v8  ;;  %909 = vmatpush2.msra.mxu0 %v712_v7 }
 0x12f   : > { %v418_v10 = vpop.xlane.xlu1 %417  ;;  %910 = vmatprep.subr.mxu0 %v2221_v21 }
 0x130   : > { %v319_v11 = vpop.xlane.xlu0 %318  ;;  %1136 = vmatpush2.msra.mxu1 %v743_v9 }
 0x131   : > { %1137 = vmatprep.subr.mxu1 %v2221_v21 }
 0x133   : > { %v675_v12 = vpop.xlane.xlu1 %674 }
 0x134   : > { %v711_v13 = vmax.f32 %v418_v10, %v675_v12  ;;  %v544_v14 = vpop.xlane.xlu0 %543 }
 0x135   : > { %v582_v15 = vadd.f32 %v544_v14, %v319_v11 }
 0x136   : > { %911 = vmatpush2.msra.mxu0 %v711_v13 }
 0x137   : > { %v742_v16 = vmul.f32 0.015625, %v582_v15  ;;  %v415_v17 = vpop.xlane.xlu1 %414  ;;  %912 = vmatprep.subr.mxu0 %v2221_v21 }
 0x138   : > { %v316_v18 = vpop.xlane.xlu0 %315 }
 0x139   : > { %1138 = vmatpush2.msra.mxu1 %v742_v16 }
 0x13a   : > { %1139 = vmatprep.subr.mxu1 %v2221_v21 }
 0x13b   : > { %v672_v19 = vpop.xlane.xlu1 %671 }
 0x13c   : > { %v710_v20 = vmax.f32 %v415_v17, %v672_v19  ;;  %v541_v22 = vpop.xlane.xlu0 %540 }
 0x13d   : > { %v581_v23 = vadd.f32 %v541_v22, %v316_v18 }
 0x13e   : > { %913 = vmatpush2.msra.mxu0 %v710_v20 }
 0x13f   : > { %v741_v24 = vmul.f32 0.015625, %v581_v23  ;;  %v412_v25 = vpop.xlane.xlu1 %411  ;;  %914 = vmatprep.subr.mxu0 %v2221_v21 }
 0x140   : > { %v313_v26 = vpop.xlane.xlu0 %312 }
 0x141   : > { %1140 = vmatpush2.msra.mxu1 %v741_v24 }
 0x142   : > { %1141 = vmatprep.subr.mxu1 %v2221_v21 }
 0x143   : > { %v669_v27 = vpop.xlane.xlu1 %668 }
 0x144   : > { %v709_v28 = vmax.f32 %v412_v25, %v669_v27  ;;  %v538_v29 = vpop.xlane.xlu0 %537 }
 0x145   : > { %v580_v30 = vadd.f32 %v538_v29, %v313_v26 }
 0x146   : > { %915 = vmatpush2.msra.mxu0 %v709_v28 }
 0x147   : > { %v740_v31 = vmul.f32 0.015625, %v580_v30  ;;  %v409_v32 = vpop.xlane.xlu1 %408  ;;  %916 = vmatprep.subr.mxu0 %v2221_v21 }
 0x148   : > { %v310_v33 = vpop.xlane.xlu0 %309 }
 0x149   : > { %1142 = vmatpush2.msra.mxu1 %v740_v31 }
 0x14a   : > { %1143 = vmatprep.subr.mxu1 %v2221_v21 }
 0x14b   : > { %v666_v34 = vpop.xlane.xlu1 %665 }
 0x14c   : > { %v708_v35 = vmax.f32 %v409_v32, %v666_v34  ;;  %v535_v36 = vpop.xlane.xlu0 %534 }
 0x14d   : > { %v579_v37 = vadd.f32 %v535_v36, %v310_v33 }
 0x14e   : > { %917 = vmatpush2.msra.mxu0 %v708_v35 }
 0x14f   : > { %v739_v38 = vmul.f32 0.015625, %v579_v37  ;;  %v406_v39 = vpop.xlane.xlu1 %405  ;;  %918 = vmatprep.subr.mxu0 %v2221_v21 }
 0x150   : > { %v307_v40 = vpop.xlane.xlu0 %306 }
 0x151   : > { %1144 = vmatpush2.msra.mxu1 %v739_v38 }
 0x152   : > { %1145 = vmatprep.subr.mxu1 %v2221_v21 }
 0x153   : > { %v663_v41 = vpop.xlane.xlu1 %662 }
 0x154   : > { %v707_v42 = vmax.f32 %v406_v39, %v663_v41  ;;  %v532_v43 = vpop.xlane.xlu0 %531 }
 0x155   : > { %v578_v44 = vadd.f32 %v532_v43, %v307_v40  ;;  %v746_v40 = vld [vmem:[%s3146_s1] sm:$0xff] }
 0x156   : > { %919 = vmatpush2.msra.mxu0 %v707_v42  ;;  %v749_v42 = vld [vmem:[%s3146_s1 + $0x18] sm:$0xff] }
 0x157   : > { %v738_v45 = vmul.f32 0.015625, %v578_v44  ;;  %v403_v46 = vpop.xlane.xlu1 %402  ;;  %920 = vmatprep.subr.mxu0 %v2221_v21  ;;  %v810_v44 = vld [vmem:[%s3147_s2] sm:$0xff] }
 0x158   : > { %v304_v47 = vpop.xlane.xlu0 %303 }
 0x159   : > { %1146 = vmatpush2.msra.mxu1 %v738_v45  ;;  %v748_v45 = vld [vmem:[%s3146_s1 + $0x10] sm:$0xff] }
 0x15a   : > { %1147 = vmatprep.subr.mxu1 %v2221_v21 }
 0x15b   : > { %v660_v48 = vpop.xlane.xlu1 %659 }
 0x15c   : > { %v706_v49 = vmax.f32 %v403_v46, %v660_v48  ;;  %v529_v50 = vpop.xlane.xlu0 %528  ;;  %v751_v46 = vld [vmem:[%s3146_s1 + $0x28] sm:$0xff] }
 0x15d   : > { %v577_v51 = vadd.f32 %v529_v50, %v304_v47  ;;  %v812_v47 = vld [vmem:[%s3147_s2 + $0x10] sm:$0xff]  ;;  %v815_v48 = vld [vmem:[%s3147_s2 + $0x28] sm:$0xff]  ;;  %v753_v50 = vld [vmem:[%s3146_s1 + $0x38] sm:$0xff] }
 0x15e   : > { %921 = vmatpush2.msra.mxu0 %v706_v49  ;;  %v750_v49 = vld [vmem:[%s3146_s1 + $0x20] sm:$0xff] }
 0x15f   : > { %v737_v52 = vmul.f32 0.015625, %v577_v51  ;;  %v400_v53 = vpop.xlane.xlu1 %399  ;;  %922 = vmatprep.subr.mxu0 %v2221_v21  ;;  %v814_v51 = vld [vmem:[%s3147_s2 + $0x20] sm:$0xff] }
 0x160   : > { %v301_v54 = vpop.xlane.xlu0 %300 }
 0x161   : > { %1148 = vmatpush2.msra.mxu1 %v737_v52  ;;  %v817_v52 = vld [vmem:[%s3147_s2 + $0x38] sm:$0xff] }
 0x162   : > { %1149 = vmatprep.subr.mxu1 %v2221_v21 }
 0x163   : > { %v657_v55 = vpop.xlane.xlu1 %656 }
 0x164   : > { %v705_v56 = vmax.f32 %v400_v53, %v657_v55  ;;  %v526_v57 = vpop.xlane.xlu0 %525  ;;  %v752_v53 = vld [vmem:[%s3146_s1 + $0x30] sm:$0xff] }
 0x165   : > { %v576_v58 = vadd.f32 %v526_v57, %v301_v54  ;;  %v755_v54 = vld [vmem:[%s3146_s1 + $0x48] sm:$0xff]  ;;  %v816_v55 = vld [vmem:[%s3147_s2 + $0x30] sm:$0xff]  ;;  %v754_v57 = vld [vmem:[%s3146_s1 + $0x40] sm:$0xff] }
 0x166   : > { %923 = vmatpush2.msra.mxu0 %v705_v56  ;;  %v819_v56 = vld [vmem:[%s3147_s2 + $0x48] sm:$0xff] }
 0x167   : > { %v736_v59 = vmul.f32 0.015625, %v576_v58  ;;  %v397_v60 = vpop.xlane.xlu1 %396  ;;  %924 = vmatprep.subr.mxu0 %v2221_v21  ;;  %v757_v58 = vld [vmem:[%s3146_s1 + $0x58] sm:$0xff] }
 0x168   : > { %v298_v61 = vpop.xlane.xlu0 %297 }
 0x169   : > { %1150 = vmatpush2.msra.mxu1 %v736_v59  ;;  %v818_v59 = vld [vmem:[%s3147_s2 + $0x40] sm:$0xff] }
 0x16a   : > { %1151 = vmatprep.subr.mxu1 %v2221_v21 }
 0x16b   : > { %v654_v62 = vpop.xlane.xlu1 %653 }
 0x16c   : > { %v704_v63 = vmax.f32 %v397_v60, %v654_v62  ;;  %v523_v0 = vpop.xlane.xlu0 %522  ;;  %v821_v60 = vld [vmem:[%s3147_s2 + $0x58] sm:$0xff]  ;;  %v759_v62 = vld [vmem:[%s3146_s1 + $0x68] sm:$0xff] }
 0x16d   : > { %v575_v1 = vadd.f32 %v523_v0, %v298_v61  ;;  %v756_v61 = vld [vmem:[%s3146_s1 + $0x50] sm:$0xff]  ;;  %v823_v0 = vld [vmem:[%s3147_s2 + $0x68] sm:$0xff] }
 0x16e   : > { %925 = vmatpush2.msra.mxu0 %v704_v63  ;;  %v820_v63 = vld [vmem:[%s3147_s2 + $0x50] sm:$0xff] }
 0x16f   : > { %v735_v2 = vmul.f32 0.015625, %v575_v1  ;;  %v394_v3 = vpop.xlane.xlu1 %393  ;;  %926 = vmatprep.subr.mxu0 %v2221_v21  ;;  %v758_v1 = vld [vmem:[%s3146_s1 + $0x60] sm:$0xff] }
 0x170   : > { %v295_v4 = vpop.xlane.xlu0 %294 }
 0x171   : > { %1152 = vmatpush2.msra.mxu1 %v735_v2  ;;  %v761_v2 = vld [vmem:[%s3146_s1 + $0x78] sm:$0xff] }
 0x172   : > { %1153 = vmatprep.subr.mxu1 %v2221_v21 }
 0x173   : > { %v651_v5 = vpop.xlane.xlu1 %650 }
 0x174   : > { %v703_v6 = vmax.f32 %v394_v3, %v651_v5  ;;  %v520_v7 = vpop.xlane.xlu0 %519  ;;  %v822_v3 = vld [vmem:[%s3147_s2 + $0x60] sm:$0xff]  ;;  %v760_v5 = vld [vmem:[%s3146_s1 + $0x70] sm:$0xff] }
 0x175   : > { %v574_v8 = vadd.f32 %v520_v7, %v295_v4  ;;  %v825_v4 = vld [vmem:[%s3147_s2 + $0x78] sm:$0xff]  ;;  %v824_v7 = vld [vmem:[%s3147_s2 + $0x70] sm:$0xff] }
 0x176   : > { %927 = vmatpush2.msra.mxu0 %v703_v6  ;;  %v763_v6 = vld [vmem:[%s3146_s1 + $0x88] sm:$0xff] }
 0x177   : > { %v734_v9 = vmul.f32 0.015625, %v574_v8  ;;  %v391_v10 = vpop.xlane.xlu1 %390  ;;  %928 = vmatprep.subr.mxu0 %v2221_v21  ;;  %v827_v8 = vld [vmem:[%s3147_s2 + $0x88] sm:$0xff] }
 0x178   : > { %v292_v11 = vpop.xlane.xlu0 %291 }
 0x179   : > { %1154 = vmatpush2.msra.mxu1 %v734_v9  ;;  %v762_v9 = vld [vmem:[%s3146_s1 + $0x80] sm:$0xff] }
 0x17a   : > { %1155 = vmatprep.subr.mxu1 %v2221_v21 }
 0x17b   : > { %v648_v12 = vpop.xlane.xlu1 %647 }
 0x17c   : > { %v702_v13 = vmax.f32 %v391_v10, %v648_v12  ;;  %v517_v14 = vpop.xlane.xlu0 %516  ;;  %v765_v10 = vld [vmem:[%s3146_s1 + $0x98] sm:$0xff] }
 0x17d   : > { %v573_v15 = vadd.f32 %v517_v14, %v292_v11  ;;  %v826_v11 = vld [vmem:[%s3147_s2 + $0x80] sm:$0xff]  ;;  %v829_v12 = vld [vmem:[%s3147_s2 + $0x98] sm:$0xff]  ;;  %v767_v14 = vld [vmem:[%s3146_s1 + $0xa8] sm:$0xff] }
 0x17e   : > { %929 = vmatpush2.msra.mxu0 %v702_v13  ;;  %v764_v13 = vld [vmem:[%s3146_s1 + $0x90] sm:$0xff] }
 0x17f   : > { %v733_v16 = vmul.f32 0.015625, %v573_v15  ;;  %v388_v17 = vpop.xlane.xlu1 %387  ;;  %930 = vmatprep.subr.mxu0 %v2221_v21  ;;  %v828_v15 = vld [vmem:[%s3147_s2 + $0x90] sm:$0xff] }
 0x180   : > { %v289_v18 = vpop.xlane.xlu0 %288 }
 0x181   : > { %1156 = vmatpush2.msra.mxu1 %v733_v16  ;;  %v831_v16 = vld [vmem:[%s3147_s2 + $0xa8] sm:$0xff] }
 0x182   : > { %1157 = vmatprep.subr.mxu1 %v2221_v21 }
 0x183   : > { %v645_v19 = vpop.xlane.xlu1 %644 }
 0x184   : > { %v701_v20 = vmax.f32 %v388_v17, %v645_v19  ;;  %v514_v22 = vpop.xlane.xlu0 %513  ;;  %v766_v17 = vld [vmem:[%s3146_s1 + $0xa0] sm:$0xff] }
 0x185   : > { %v572_v23 = vadd.f32 %v514_v22, %v289_v18  ;;  %v769_v18 = vld [vmem:[%s3146_s1 + $0xb8] sm:$0xff]  ;;  %v830_v19 = vld [vmem:[%s3147_s2 + $0xa0] sm:$0xff]  ;;  %v768_v22 = vld [vmem:[%s3146_s1 + $0xb0] sm:$0xff] }
 0x186   : > { %931 = vmatpush2.msra.mxu0 %v701_v20  ;;  %v833_v20 = vld [vmem:[%s3147_s2 + $0xb8] sm:$0xff] }
 0x187   : > { %v732_v24 = vmul.f32 0.015625, %v572_v23  ;;  %v385_v25 = vpop.xlane.xlu1 %384  ;;  %932 = vmatprep.subr.mxu0 %v2221_v21  ;;  %v771_v23 = vld [vmem:[%s3146_s1 + $0xc8] sm:$0xff] }
 0x188   : > { %v286_v26 = vpop.xlane.xlu0 %285 }
 0x189   : > { %1158 = vmatpush2.msra.mxu1 %v732_v24  ;;  %v832_v24 = vld [vmem:[%s3147_s2 + $0xb0] sm:$0xff] }
 0x18a   : > { %1159 = vmatprep.subr.mxu1 %v2221_v21 }
 0x18b   : > { %v642_v27 = vpop.xlane.xlu1 %641 }
 0x18c   : > { %v700_v28 = vmax.f32 %v385_v25, %v642_v27  ;;  %v511_v29 = vpop.xlane.xlu0 %510  ;;  %v835_v25 = vld [vmem:[%s3147_s2 + $0xc8] sm:$0xff]  ;;  %v773_v27 = vld [vmem:[%s3146_s1 + $0xd8] sm:$0xff] }
 0x18d   : > { %v571_v30 = vadd.f32 %v511_v29, %v286_v26  ;;  %v770_v26 = vld [vmem:[%s3146_s1 + $0xc0] sm:$0xff]  ;;  %v837_v29 = vld [vmem:[%s3147_s2 + $0xd8] sm:$0xff] }
 0x18e   : > { %933 = vmatpush2.msra.mxu0 %v700_v28  ;;  %v834_v28 = vld [vmem:[%s3147_s2 + $0xc0] sm:$0xff] }
 0x18f   : > { %v731_v31 = vmul.f32 0.015625, %v571_v30  ;;  %v382_v32 = vpop.xlane.xlu1 %381  ;;  %934 = vmatprep.subr.mxu0 %v2221_v21  ;;  %v772_v30 = vld [vmem:[%s3146_s1 + $0xd0] sm:$0xff] }
 0x190   : > { %v283_v33 = vpop.xlane.xlu0 %282 }
 0x191   : > { %1160 = vmatpush2.msra.mxu1 %v731_v31  ;;  %v775_v31 = vld [vmem:[%s3146_s1 + $0xe8] sm:$0xff] }
 0x192   : > { %1161 = vmatprep.subr.mxu1 %v2221_v21 }
 0x193   : > { %v639_v34 = vpop.xlane.xlu1 %638 }
 0x194   : > { %v699_v35 = vmax.f32 %v382_v32, %v639_v34  ;;  %v508_v36 = vpop.xlane.xlu0 %507  ;;  %v836_v32 = vld [vmem:[%s3147_s2 + $0xd0] sm:$0xff]  ;;  %v774_v34 = vld [vmem:[%s3146_s1 + $0xe0] sm:$0xff] }
 0x195   : > { %v570_v37 = vadd.f32 %v508_v36, %v283_v33  ;;  %v839_v33 = vld [vmem:[%s3147_s2 + $0xe8] sm:$0xff]  ;;  %v838_v36 = vld [vmem:[%s3147_s2 + $0xe0] sm:$0xff] }
 0x196   : > { %935 = vmatpush2.msra.mxu0 %v699_v35  ;;  %v777_v35 = vld [vmem:[%s3146_s1 + $0xf8] sm:$0xff] }
 0x197   : > { %v730_v38 = vmul.f32 0.015625, %v570_v37  ;;  %v636_v39 = vpop.xlane.xlu1 %635  ;;  %936 = vmatprep.subr.mxu0 %v2221_v21  ;;  %v813_v21 = vld [vmem:[%s3147_s2 + $0x18] sm:$0xff] }
 0x198   : > { %v379_v41 = vpop.xlane.xlu0 %378  ;;  %v841_v37 = vld [vmem:[%s3147_s2 + $0xf8] sm:$0xff] }
 0x199   : > { %v698_v43 = vmax.f32 %v379_v41, %v636_v39  ;;  %1162 = vmatpush2.msra.mxu1 %v730_v38  ;;  %v776_v38 = vld [vmem:[%s3146_s1 + $0xf0] sm:$0xff]  ;;  %v779_v39 = vld [vmem:[%s3146_s1 + $0x108] sm:$0xff] }
 0x19a   : > { %1164 = vmatmul.mubr.f32.vlgmr.msra.gmra.mxu1 %v746_v40  ;;  %v840_v40 = vld [vmem:[%s3147_s2 + $0xf0] sm:$0xff]  ;;  %v843_v41 = vld [vmem:[%s3147_s2 + $0x108] sm:$0xff] }
 0x19b   : > { %937 = vmatpush2.msra.mxu0 %v698_v43  ;;  %1168 = vmatprep.mubr.f32.mxu1 %v749_v42  ;;  %v778_v42 = vld [vmem:[%s3146_s1 + $0x100] sm:$0xff]  ;;  %v781_v43 = vld [vmem:[%s3146_s1 + $0x118] sm:$0xff] }
 0x19c   : > { %939 = vmatmul.mubr.f32.vlgmr.msra.gmra.mxu0 %v810_v44  ;;  %v842_v44 = vld [vmem:[%s3147_s2 + $0x100] sm:$0xff] }
 0x19d   : > { %943 = vmatprep.mubr.f32.mxu0 %v813_v21  ;;  %v845_v21 = vld [vmem:[%s3147_s2 + $0x118] sm:$0xff] }
 0x19e   : > { %1169 = vmatmul.mubr.f32.gmra.mxu1 %v748_v45  ;;  %v780_v45 = vld [vmem:[%s3146_s1 + $0x110] sm:$0xff] }
 0x19f   : > { %1173 = vmatprep.mubr.f32.mxu1 %v751_v46  ;;  %v783_v46 = vld [vmem:[%s3146_s1 + $0x128] sm:$0xff] }
 0x1a0   : > { %944 = vmatmul.mubr.f32.gmra.mxu0 %v812_v47  ;;  %v844_v47 = vld [vmem:[%s3147_s2 + $0x110] sm:$0xff] }
 0x1a1   : > { %948 = vmatprep.mubr.f32.mxu0 %v815_v48  ;;  %v847_v48 = vld [vmem:[%s3147_s2 + $0x128] sm:$0xff] }
 0x1a2   : > { %1174 = vmatmul.mubr.f32.gmra.mxu1 %v750_v49  ;;  %v782_v49 = vld [vmem:[%s3146_s1 + $0x120] sm:$0xff] }
 0x1a3   : > { %1178 = vmatprep.mubr.f32.mxu1 %v753_v50  ;;  %v785_v50 = vld [vmem:[%s3146_s1 + $0x138] sm:$0xff] }
 0x1a4   : > { %949 = vmatmul.mubr.f32.gmra.mxu0 %v814_v51  ;;  %v846_v51 = vld [vmem:[%s3147_s2 + $0x120] sm:$0xff] }
 0x1a5   : > { %953 = vmatprep.mubr.f32.mxu0 %v817_v52  ;;  %v849_v52 = vld [vmem:[%s3147_s2 + $0x138] sm:$0xff] }
 0x1a6   : > { %1179 = vmatmul.mubr.f32.gmra.mxu1 %v752_v53  ;;  %v784_v53 = vld [vmem:[%s3146_s1 + $0x130] sm:$0xff] }
 0x1a7   : > { %1183 = vmatprep.mubr.f32.mxu1 %v755_v54  ;;  %v787_v54 = vld [vmem:[%s3146_s1 + $0x148] sm:$0xff] }
 0x1a8   : > { %954 = vmatmul.mubr.f32.gmra.mxu0 %v816_v55  ;;  %v848_v55 = vld [vmem:[%s3147_s2 + $0x130] sm:$0xff] }
 0x1a9   : > { %958 = vmatprep.mubr.f32.mxu0 %v819_v56  ;;  %v851_v56 = vld [vmem:[%s3147_s2 + $0x148] sm:$0xff] }
 0x1aa   : > { %1184 = vmatmul.mubr.f32.gmra.mxu1 %v754_v57  ;;  %v786_v57 = vld [vmem:[%s3146_s1 + $0x140] sm:$0xff] }
 0x1ab   : > { %1188 = vmatprep.mubr.f32.mxu1 %v757_v58  ;;  %v789_v58 = vld [vmem:[%s3146_s1 + $0x158] sm:$0xff] }
 0x1ac   : > { %959 = vmatmul.mubr.f32.gmra.mxu0 %v818_v59  ;;  %v850_v59 = vld [vmem:[%s3147_s2 + $0x140] sm:$0xff] }
 0x1ad   : > { %963 = vmatprep.mubr.f32.mxu0 %v821_v60  ;;  %v853_v60 = vld [vmem:[%s3147_s2 + $0x158] sm:$0xff] }
 0x1ae   : > { %1189 = vmatmul.mubr.f32.gmra.mxu1 %v756_v61  ;;  %v788_v61 = vld [vmem:[%s3146_s1 + $0x150] sm:$0xff] }
 0x1af   : > { %1193 = vmatprep.mubr.f32.mxu1 %v759_v62  ;;  %v791_v62 = vld [vmem:[%s3146_s1 + $0x168] sm:$0xff] }
 0x1b0   : > { %964 = vmatmul.mubr.f32.gmra.mxu0 %v820_v63  ;;  %v852_v63 = vld [vmem:[%s3147_s2 + $0x150] sm:$0xff] }
 0x1b1   : > { %968 = vmatprep.mubr.f32.mxu0 %v823_v0  ;;  %v855_v0 = vld [vmem:[%s3147_s2 + $0x168] sm:$0xff] }
 0x1b2   : > { %1194 = vmatmul.mubr.f32.gmra.mxu1 %v758_v1  ;;  %v790_v1 = vld [vmem:[%s3146_s1 + $0x160] sm:$0xff] }
 0x1b3   : > { %1198 = vmatprep.mubr.f32.mxu1 %v761_v2  ;;  %v793_v2 = vld [vmem:[%s3146_s1 + $0x178] sm:$0xff] }
 0x1b4   : > { %969 = vmatmul.mubr.f32.gmra.mxu0 %v822_v3  ;;  %v854_v3 = vld [vmem:[%s3147_s2 + $0x160] sm:$0xff] }
 0x1b5   : > { %973 = vmatprep.mubr.f32.mxu0 %v825_v4  ;;  %v857_v4 = vld [vmem:[%s3147_s2 + $0x178] sm:$0xff] }
 0x1b6   : > { %1199 = vmatmul.mubr.f32.gmra.mxu1 %v760_v5  ;;  %v792_v5 = vld [vmem:[%s3146_s1 + $0x170] sm:$0xff] }
 0x1b7   : > { %1203 = vmatprep.mubr.f32.mxu1 %v763_v6  ;;  %v795_v6 = vld [vmem:[%s3146_s1 + $0x188] sm:$0xff] }
 0x1b8   : > { %974 = vmatmul.mubr.f32.gmra.mxu0 %v824_v7  ;;  %v856_v7 = vld [vmem:[%s3147_s2 + $0x170] sm:$0xff] }
 0x1b9   : > { %978 = vmatprep.mubr.f32.mxu0 %v827_v8  ;;  %v859_v8 = vld [vmem:[%s3147_s2 + $0x188] sm:$0xff] }
 0x1ba   : > { %1204 = vmatmul.mubr.f32.gmra.mxu1 %v762_v9  ;;  %v794_v9 = vld [vmem:[%s3146_s1 + $0x180] sm:$0xff] }
 0x1bb   : > { %1208 = vmatprep.mubr.f32.mxu1 %v765_v10  ;;  %v797_v10 = vld [vmem:[%s3146_s1 + $0x198] sm:$0xff] }
 0x1bc   : > { %979 = vmatmul.mubr.f32.gmra.mxu0 %v826_v11  ;;  %v858_v11 = vld [vmem:[%s3147_s2 + $0x180] sm:$0xff] }
 0x1bd   : > { %983 = vmatprep.mubr.f32.mxu0 %v829_v12  ;;  %v861_v12 = vld [vmem:[%s3147_s2 + $0x198] sm:$0xff] }
 0x1be   : > { %1209 = vmatmul.mubr.f32.gmra.mxu1 %v764_v13  ;;  %v796_v13 = vld [vmem:[%s3146_s1 + $0x190] sm:$0xff] }
 0x1bf   : > { %1213 = vmatprep.mubr.f32.mxu1 %v767_v14  ;;  %v799_v14 = vld [vmem:[%s3146_s1 + $0x1a8] sm:$0xff] }
 0x1c0   : > { %984 = vmatmul.mubr.f32.gmra.mxu0 %v828_v15  ;;  %v860_v15 = vld [vmem:[%s3147_s2 + $0x190] sm:$0xff] }
 0x1c1   : > { %988 = vmatprep.mubr.f32.mxu0 %v831_v16  ;;  %v863_v16 = vld [vmem:[%s3147_s2 + $0x1a8] sm:$0xff] }
 0x1c2   : > { %1214 = vmatmul.mubr.f32.gmra.mxu1 %v766_v17  ;;  %v798_v17 = vld [vmem:[%s3146_s1 + $0x1a0] sm:$0xff] }
 0x1c3   : > { %1218 = vmatprep.mubr.f32.mxu1 %v769_v18  ;;  %v801_v18 = vld [vmem:[%s3146_s1 + $0x1b8] sm:$0xff] }
 0x1c4   : > { %989 = vmatmul.mubr.f32.gmra.mxu0 %v830_v19  ;;  %v862_v19 = vld [vmem:[%s3147_s2 + $0x1a0] sm:$0xff] }
 0x1c5   : > { %993 = vmatprep.mubr.f32.mxu0 %v833_v20  ;;  %v865_v20 = vld [vmem:[%s3147_s2 + $0x1b8] sm:$0xff] }
 0x1c6   : > { %1219 = vmatmul.mubr.f32.gmra.mxu1 %v768_v22  ;;  %v800_v22 = vld [vmem:[%s3146_s1 + $0x1b0] sm:$0xff] }
 0x1c7   : > { %1223 = vmatprep.mubr.f32.mxu1 %v771_v23  ;;  %v2222_v23 = vmov 0  }
 0x1c8   : > { %994 = vmatmul.mubr.f32.gmra.mxu0 %v832_v24  ;;  %2051 = vset.pattern.permute.xlu0 %v2222_v23  ;;  %v803_v24 = vld [vmem:[%s3146_s1 + $0x1c8] sm:$0xff] }
 0x1c9   : > { %998 = vmatprep.mubr.f32.mxu0 %v835_v25  ;;  %2052 = vset.pattern.permute.xlu1 %v2222_v23  ;;  %v864_v25 = vld [vmem:[%s3147_s2 + $0x1b0] sm:$0xff] }
 0x1ca   : > { %1224 = vmatmul.mubr.f32.gmra.mxu1 %v770_v26  ;;  %v867_v26 = vld [vmem:[%s3147_s2 + $0x1c8] sm:$0xff] }
 0x1cb   : > { %1228 = vmatprep.mubr.f32.mxu1 %v773_v27  ;;  %v802_v27 = vld [vmem:[%s3146_s1 + $0x1c0] sm:$0xff] }
 0x1cc   : > { %999 = vmatmul.mubr.f32.gmra.mxu0 %v834_v28  ;;  %v805_v28 = vld [vmem:[%s3146_s1 + $0x1d8] sm:$0xff] }
 0x1cd   : > { %1003 = vmatprep.mubr.f32.mxu0 %v837_v29  ;;  %v866_v29 = vld [vmem:[%s3147_s2 + $0x1c0] sm:$0xff] }
 0x1ce   : > { %1229 = vmatmul.mubr.f32.gmra.mxu1 %v772_v30  ;;  %v869_v30 = vld [vmem:[%s3147_s2 + $0x1d8] sm:$0xff] }
 0x1cf   : > { %1233 = vmatprep.mubr.f32.mxu1 %v775_v31  ;;  %v804_v31 = vld [vmem:[%s3146_s1 + $0x1d0] sm:$0xff] }
 0x1d0   : > { %1004 = vmatmul.mubr.f32.gmra.mxu0 %v836_v32  ;;  %v807_v32 = vld [vmem:[%s3146_s1 + $0x1e8] sm:$0xff] }
 0x1d1   : > { %1008 = vmatprep.mubr.f32.mxu0 %v839_v33  ;;  %v868_v33 = vld [vmem:[%s3147_s2 + $0x1d0] sm:$0xff] }
 0x1d2   : > { %1234 = vmatmul.mubr.f32.gmra.mxu1 %v774_v34  ;;  %v871_v34 = vld [vmem:[%s3147_s2 + $0x1e8] sm:$0xff] }
 0x1d3   : > { %1238 = vmatprep.mubr.f32.mxu1 %v777_v35  ;;  %v806_v35 = vld [vmem:[%s3146_s1 + $0x1e0] sm:$0xff] }
 0x1d4   : > { %1009 = vmatmul.mubr.f32.gmra.mxu0 %v838_v36  ;;  %v809_v36 = vld [vmem:[%s3146_s1 + $0x1f8] sm:$0xff] }
 0x1d5   : > { %1013 = vmatprep.mubr.f32.mxu0 %v841_v37  ;;  %v870_v37 = vld [vmem:[%s3147_s2 + $0x1e0] sm:$0xff] }
 0x1d6   : > { %1239 = vmatmul.mubr.f32.gmra.mxu1 %v776_v38  ;;  %v873_v38 = vld [vmem:[%s3147_s2 + $0x1f8] sm:$0xff] }
 0x1d7   : > { %1243 = vmatprep.mubr.f32.mxu1 %v779_v39  ;;  %v808_v39 = vld [vmem:[%s3146_s1 + $0x1f0] sm:$0xff] }
 0x1d8   : > { %1014 = vmatmul.mubr.f32.gmra.mxu0 %v840_v40  ;;  %v872_v40 = vld [vmem:[%s3147_s2 + $0x1f0] sm:$0xff] }
 0x1d9   : > { %1018 = vmatprep.mubr.f32.mxu0 %v843_v41 }
 0x1da   : > { %1244 = vmatmul.mubr.f32.gmra.mxu1 %v778_v42 }
 0x1db   : > { %1248 = vmatprep.mubr.f32.mxu1 %v781_v43  ;;  %v2909_v43 = vld [vmem:[#allocation2] ss:$0 sm:$0xff] }
 0x1dc   : > { %1019 = vmatmul.mubr.f32.gmra.mxu0 %v842_v44 }
 0x1dd   : > { %1023 = vmatprep.mubr.f32.mxu0 %v845_v21 }
 0x1de   : > { %1249 = vmatmul.mubr.f32.gmra.mxu1 %v780_v45 }
 0x1df   : > { %1253 = vmatprep.mubr.f32.mxu1 %v783_v46 }
 0x1e0   : > { %1024 = vmatmul.mubr.f32.gmra.mxu0 %v844_v47 }
 0x1e1   : > { %1028 = vmatprep.mubr.f32.mxu0 %v847_v48 }
 0x1e2   : > { %1254 = vmatmul.mubr.f32.gmra.mxu1 %v782_v49 }
 0x1e3   : > { %1258 = vmatprep.mubr.f32.mxu1 %v785_v50 }
 0x1e4   : > { %1029 = vmatmul.mubr.f32.gmra.mxu0 %v846_v51 }
 0x1e5   : > { %1033 = vmatprep.mubr.f32.mxu0 %v849_v52 }
 0x1e6   : > { %1259 = vmatmul.mubr.f32.gmra.mxu1 %v784_v53 }
 0x1e7   : > { %1263 = vmatprep.mubr.f32.mxu1 %v787_v54 }
 0x1e8   : > { %1034 = vmatmul.mubr.f32.gmra.mxu0 %v848_v55 }
 0x1e9   : > { %1038 = vmatprep.mubr.f32.mxu0 %v851_v56 }
 0x1ea   : > { %1264 = vmatmul.mubr.f32.gmra.mxu1 %v786_v57 }
 0x1eb   : > { %1268 = vmatprep.mubr.f32.mxu1 %v789_v58 }
 0x1ec   : > { %1039 = vmatmul.mubr.f32.gmra.mxu0 %v850_v59 }
 0x1ed   : > { %1043 = vmatprep.mubr.f32.mxu0 %v853_v60 }
 0x1ee   : > { %1269 = vmatmul.mubr.f32.gmra.mxu1 %v788_v61 }
 0x1ef   : > { %1273 = vmatprep.mubr.f32.mxu1 %v791_v62 }
 0x1f0   : > { %1044 = vmatmul.mubr.f32.gmra.mxu0 %v852_v63 }
 0x1f1   : > { %1048 = vmatprep.mubr.f32.mxu0 %v855_v0 }
 0x1f2   : > { %1274 = vmatmul.mubr.f32.gmra.mxu1 %v790_v1 }
 0x1f3   : > { %1278 = vmatprep.mubr.f32.mxu1 %v793_v2 }
 0x1f4   : > { %1049 = vmatmul.mubr.f32.gmra.mxu0 %v854_v3 }
 0x1f5   : > { %1053 = vmatprep.mubr.f32.mxu0 %v857_v4 }
 0x1f6   : > { %1279 = vmatmul.mubr.f32.gmra.mxu1 %v792_v5 }
 0x1f7   : > { %1283 = vmatprep.mubr.f32.mxu1 %v795_v6 }
 0x1f8   : > { %1054 = vmatmul.mubr.f32.gmra.mxu0 %v856_v7 }
 0x1f9   : > { %1058 = vmatprep.mubr.f32.mxu0 %v859_v8 }
 0x1fa   : > { %1284 = vmatmul.mubr.f32.gmra.mxu1 %v794_v9 }
 0x1fb   : > { %1288 = vmatprep.mubr.f32.mxu1 %v797_v10 }
 0x1fc   : > { %1059 = vmatmul.mubr.f32.gmra.mxu0 %v858_v11 }
 0x1fd   : > { %1063 = vmatprep.mubr.f32.mxu0 %v861_v12 }
 0x1fe   : > { %1289 = vmatmul.mubr.f32.gmra.mxu1 %v796_v13 }
 0x1ff   : > { %1293 = vmatprep.mubr.f32.mxu1 %v799_v14 }
 0x200   : > { %1064 = vmatmul.mubr.f32.gmra.mxu0 %v860_v15 }
 0x201   : > { %1068 = vmatprep.mubr.f32.mxu0 %v863_v16 }
 0x202   : > { %1294 = vmatmul.mubr.f32.gmra.mxu1 %v798_v17 }
 0x203   : > { %1298 = vmatprep.mubr.f32.mxu1 %v801_v18 }
 0x204   : > { %1069 = vmatmul.mubr.f32.gmra.mxu0 %v862_v19 }
 0x205   : > { %1073 = vmatprep.mubr.f32.mxu0 %v865_v20 }
 0x206   : > { %1299 = vmatmul.mubr.f32.gmra.mxu1 %v800_v22 }
 0x207   : > { %1303 = vmatprep.mubr.f32.mxu1 %v803_v24 }
 0x208   : > { %1074 = vmatmul.mubr.f32.gmra.mxu0 %v864_v25 }
 0x209   : > { %1078 = vmatprep.mubr.f32.mxu0 %v867_v26 }
 0x20a   : > { %1304 = vmatmul.mubr.f32.gmra.mxu1 %v802_v27 }
 0x20b   : > { %1308 = vmatprep.mubr.f32.mxu1 %v805_v28 }
 0x20c   : > { %1079 = vmatmul.mubr.f32.gmra.mxu0 %v866_v29 }
 0x20d   : > { %1083 = vmatprep.mubr.f32.mxu0 %v869_v30 }
 0x20e   : > { %1309 = vmatmul.mubr.f32.gmra.mxu1 %v804_v31 }
 0x20f   : > { %1313 = vmatprep.mubr.f32.mxu1 %v807_v32 }
 0x210   : > { %1084 = vmatmul.mubr.f32.gmra.mxu0 %v868_v33 }
 0x211   : > { %1088 = vmatprep.mubr.f32.mxu0 %v871_v34 }
 0x212   : > { %1314 = vmatmul.mubr.f32.gmra.mxu1 %v806_v35 }
 0x213   : > { %1318 = vmatprep.mubr.f32.mxu1 %v809_v36 }
 0x214   : > { %1089 = vmatmul.mubr.f32.gmra.mxu0 %v870_v37 }
 0x215   : > { %1093 = vmatprep.mubr.f32.mxu0 %v873_v38 }
 0x216   : > { %1319 = vmatmul.mubr.f32.gmra.mxu1 %v808_v39 }
 0x218   : > { %1094 = vmatmul.mubr.f32.gmra.mxu0 %v872_v40 }
 0x25a   : > { %v1165_v41 = vpop.f32.mrf.mxu1 }
 0x25c   : > { %v940_v42 = vpop.f32.mrf.mxu0  ;;  %v1167_v44 = vpop.f32.mrf.mxu1 }
 0x25d   : > { %v1166_v21 = vadd.f32 %v1165_v41, %v940_v42 }
 0x25e   : > { %v942_v45 = vpop.f32.mrf.mxu0  ;;  %v1170_v46 = vpop.f32.mrf.mxu1 }
 0x25f   : > { %v1331_v47 = vadd.f32 %v2909_v43, %v1166_v21 }
 0x260   : > { %v945_v48 = vpop.f32.mrf.mxu0  ;;  %v1172_v49 = vpop.f32.mrf.mxu1 }
 0x261   : > { %v1363_v50 = vsub.f32 0.0, %v1331_v47  ;;  %v1171_v51 = vadd.f32 %v1170_v46, %v945_v48 }
 0x262   : > { %v947_v52 = vpop.f32.mrf.mxu0  ;;  %v1175_v53 = vpop.f32.mrf.mxu1 }
 0x263   : > { %v1395_v54 = vmul.f32 1.442695, %v1363_v50  ;;  %v1332_v55 = vadd.f32 %v2909_v43, %v1171_v51 }
 0x264   : > { %v950_v56 = vpop.f32.mrf.mxu0  ;;  %v1177_v57 = vpop.f32.mrf.mxu1 }
 0x265   : > { %2053 = vpow2.f32 %v1395_v54  ;;  %v1364_v58 = vsub.f32 0.0, %v1332_v55  ;;  %v1176_v59 = vadd.f32 %v1175_v53, %v950_v56 }
 0x266   : > { %v952_v60 = vpop.f32.mrf.mxu0  ;;  %v1180_v61 = vpop.f32.mrf.mxu1 }
 0x267   : > { %v1397_v62 = vmul.f32 1.442695, %v1364_v58  ;;  %v1333_v63 = vadd.f32 %v2909_v43, %v1176_v59 }
 0x268   : > { %v955_v0 = vpop.f32.mrf.mxu0  ;;  %v1182_v1 = vpop.f32.mrf.mxu1 }
 0x269   : > { %2055 = vpow2.f32 %v1397_v62  ;;  %v1365_v2 = vsub.f32 0.0, %v1333_v63  ;;  %v1181_v3 = vadd.f32 %v1180_v61, %v955_v0 }
 0x26a   : > { %v957_v4 = vpop.f32.mrf.mxu0  ;;  %v1185_v5 = vpop.f32.mrf.mxu1 }
 0x26b   : > { %v1399_v6 = vmul.f32 1.442695, %v1365_v2  ;;  %v1334_v7 = vadd.f32 %v2909_v43, %v1181_v3 }
 0x26c   : > { %v960_v8 = vpop.f32.mrf.mxu0  ;;  %v1187_v9 = vpop.f32.mrf.mxu1 }
 0x26d   : > { %2057 = vpow2.f32 %v1399_v6  ;;  %v1366_v10 = vsub.f32 0.0, %v1334_v7  ;;  %v1186_v11 = vadd.f32 %v1185_v5, %v960_v8 }
 0x26e   : > { %v962_v12 = vpop.f32.mrf.mxu0  ;;  %v1190_v13 = vpop.f32.mrf.mxu1 }
 0x26f   : > { %v1401_v14 = vmul.f32 1.442695, %v1366_v10  ;;  %v1335_v15 = vadd.f32 %v2909_v43, %v1186_v11 }
 0x270   : > { %v965_v16 = vpop.f32.mrf.mxu0  ;;  %v1192_v17 = vpop.f32.mrf.mxu1 }
 0x271   : > { %2059 = vpow2.f32 %v1401_v14  ;;  %v1367_v18 = vsub.f32 0.0, %v1335_v15  ;;  %v1191_v19 = vadd.f32 %v1190_v13, %v965_v16 }
 0x272   : > { %v2054_v20 = vpop.eup %2053  ;;  %v967_v22 = vpop.f32.mrf.mxu0 }
 0x273   : > { %v1195_v23 = vpop.f32.mrf.mxu1  ;;  %v1459_v24 = vadd.f32 1.0, %v2054_v20  ;;  %v1403_v25 = vmul.f32 1.442695, %v1367_v18  ;;  %v1336_v26 = vadd.f32 %v2909_v43, %v1191_v19 }
 0x274   : > { %v970_v27 = vpop.f32.mrf.mxu0 }
 0x275   : > { %v1197_v28 = vpop.f32.mrf.mxu1  ;;  %2061 = vrcp.f32 %v1459_v24  ;;  %v1368_v29 = vsub.f32 0.0, %v1336_v26  ;;  %v1196_v30 = vadd.f32 %v1195_v23, %v970_v27 }
 0x276   : > { %v2056_v31 = vpop.eup %2055  ;;  %2063 = vpow2.f32 %v1403_v25  ;;  %v972_v32 = vpop.f32.mrf.mxu0 }
 0x277   : > { %v1200_v33 = vpop.f32.mrf.mxu1  ;;  %v1460_v34 = vadd.f32 1.0, %v2056_v31  ;;  %v1405_v35 = vmul.f32 1.442695, %v1368_v29  ;;  %v1337_v36 = vadd.f32 %v2909_v43, %v1196_v30 }
 0x278   : > { %v975_v37 = vpop.f32.mrf.mxu0 }
 0x279   : > { %v1202_v38 = vpop.f32.mrf.mxu1  ;;  %2065 = vrcp.f32 %v1460_v34  ;;  %v1369_v39 = vsub.f32 0.0, %v1337_v36  ;;  %v1201_v40 = vadd.f32 %v1200_v33, %v975_v37 }
 0x27a   : > { %v2058_v41 = vpop.eup %2057  ;;  %2067 = vpow2.f32 %v1405_v35  ;;  %v977_v42 = vpop.f32.mrf.mxu0 }
 0x27b   : > { %v1205_v44 = vpop.f32.mrf.mxu1  ;;  %v1461_v21 = vadd.f32 1.0, %v2058_v41  ;;  %v1407_v45 = vmul.f32 1.442695, %v1369_v39  ;;  %v1338_v46 = vadd.f32 %v2909_v43, %v1201_v40 }
 0x27c   : > { %v980_v47 = vpop.f32.mrf.mxu0 }
 0x27d   : > { %v1207_v48 = vpop.f32.mrf.mxu1  ;;  %2069 = vrcp.f32 %v1461_v21  ;;  %v1370_v49 = vsub.f32 0.0, %v1338_v46  ;;  %v1206_v50 = vadd.f32 %v1205_v44, %v980_v47 }
 0x27e   : > { %v2060_v51 = vpop.eup %2059  ;;  %2071 = vpow2.f32 %v1407_v45  ;;  %v982_v52 = vpop.f32.mrf.mxu0 }
 0x27f   : > { %v1210_v53 = vpop.f32.mrf.mxu1  ;;  %v1462_v54 = vadd.f32 1.0, %v2060_v51  ;;  %v1409_v55 = vmul.f32 1.442695, %v1370_v49  ;;  %v1339_v56 = vadd.f32 %v2909_v43, %v1206_v50 }
 0x280   : > { %v985_v57 = vpop.f32.mrf.mxu0 }
 0x281   : > { %v1212_v58 = vpop.f32.mrf.mxu1  ;;  %2073 = vrcp.f32 %v1462_v54  ;;  %v1371_v59 = vsub.f32 0.0, %v1339_v56  ;;  %v1211_v60 = vadd.f32 %v1210_v53, %v985_v57 }
 0x282   : > { %v2062_v61 = vpop.eup %2061  ;;  %2075 = vpow2.f32 %v1409_v55  ;;  %v987_v62 = vpop.f32.mrf.mxu0 }
 0x283   : > { %v1215_v63 = vpop.f32.mrf.mxu1  ;;  %v2064_v0 = vpop.eup %2063  ;;  %v1411_v1 = vmul.f32 1.442695, %v1371_v59  ;;  %v1340_v2 = vadd.f32 %v2909_v43, %v1211_v60  ;;  %1557 = vperm.xlu0 %2051, %v2062_v61  }
 0x284   : > { %v1463_v3 = vadd.f32 1.0, %v2064_v0  ;;  %v990_v4 = vpop.f32.mrf.mxu0 }
 0x285   : > { %v1217_v5 = vpop.f32.mrf.mxu1  ;;  %2077 = vpow2.f32 %v1411_v1  ;;  %v1372_v6 = vsub.f32 0.0, %v1340_v2  ;;  %v1216_v7 = vadd.f32 %v1215_v63, %v990_v4 }
 0x286   : > { %v2066_v8 = vpop.eup %2065  ;;  %2079 = vrcp.f32 %v1463_v3  ;;  %v992_v9 = vpop.f32.mrf.mxu0 }
 0x287   : > { %v1220_v10 = vpop.f32.mrf.mxu1  ;;  %v2068_v11 = vpop.eup %2067  ;;  %v1413_v12 = vmul.f32 1.442695, %v1372_v6  ;;  %v1341_v13 = vadd.f32 %v2909_v43, %v1216_v7  ;;  %1562 = vperm.xlu1 %2052, %v2066_v8  }
 0x288   : > { %v1464_v14 = vadd.f32 1.0, %v2068_v11  ;;  %v995_v15 = vpop.f32.mrf.mxu0 }
 0x289   : > { %v1222_v16 = vpop.f32.mrf.mxu1  ;;  %2081 = vpow2.f32 %v1413_v12  ;;  %v1373_v17 = vsub.f32 0.0, %v1341_v13  ;;  %v1221_v18 = vadd.f32 %v1220_v10, %v995_v15 }
 0x28a   : > { %v2070_v19 = vpop.eup %2069  ;;  %2083 = vrcp.f32 %v1464_v14  ;;  %v997_v20 = vpop.f32.mrf.mxu0 }
 0x28b   : > { %v1225_v22 = vpop.f32.mrf.mxu1  ;;  %v2072_v23 = vpop.eup %2071  ;;  %v1415_v24 = vmul.f32 1.442695, %v1373_v17  ;;  %v1342_v25 = vadd.f32 %v2909_v43, %v1221_v18  ;;  %1567 = vperm.xlu1 %2052, %v2070_v19  }
 0x28c   : > { %v1465_v26 = vadd.f32 1.0, %v2072_v23  ;;  %v1000_v27 = vpop.f32.mrf.mxu0 }
 0x28d   : > { %v1227_v28 = vpop.f32.mrf.mxu1  ;;  %2085 = vpow2.f32 %v1415_v24  ;;  %v1374_v29 = vsub.f32 0.0, %v1342_v25  ;;  %v1226_v30 = vadd.f32 %v1225_v22, %v1000_v27 }
 0x28e   : > { %v2074_v31 = vpop.eup %2073  ;;  %2087 = vrcp.f32 %v1465_v26  ;;  %v1002_v32 = vpop.f32.mrf.mxu0 }
 0x28f   : > { %v1230_v33 = vpop.f32.mrf.mxu1  ;;  %v2076_v34 = vpop.eup %2075  ;;  %v1417_v35 = vmul.f32 1.442695, %v1374_v29  ;;  %v1343_v36 = vadd.f32 %v2909_v43, %v1226_v30  ;;  %1572 = vperm.xlu1 %2052, %v2074_v31  }
 0x290   : > { %v1466_v37 = vadd.f32 1.0, %v2076_v34  ;;  %v1005_v38 = vpop.f32.mrf.mxu0 }
 0x291   : > { %v1232_v39 = vpop.f32.mrf.mxu1  ;;  %2089 = vpow2.f32 %v1417_v35  ;;  %v1375_v40 = vsub.f32 0.0, %v1343_v36  ;;  %v1231_v41 = vadd.f32 %v1230_v33, %v1005_v38 }
 0x292   : > { %v2078_v42 = vpop.eup %2077  ;;  %2091 = vrcp.f32 %v1466_v37  ;;  %v1007_v44 = vpop.f32.mrf.mxu0 }
 0x293   : > { %v1235_v21 = vpop.f32.mrf.mxu1  ;;  %v2080_v45 = vpop.eup %2079  ;;  %v1467_v46 = vadd.f32 1.0, %v2078_v42  ;;  %v1419_v47 = vmul.f32 1.442695, %v1375_v40  ;;  %v1344_v48 = vadd.f32 %v2909_v43, %v1231_v41 }
 0x294   : > { %1577 = vperm.xlu1 %2052, %v2080_v45   ;;  %v1010_v49 = vpop.f32.mrf.mxu0 }
 0x295   : > { %v1237_v50 = vpop.f32.mrf.mxu1  ;;  %2093 = vrcp.f32 %v1467_v46  ;;  %v1376_v51 = vsub.f32 0.0, %v1344_v48  ;;  %v1236_v52 = vadd.f32 %v1235_v21, %v1010_v49 }
 0x296   : > { %v2082_v53 = vpop.eup %2081  ;;  %2095 = vpow2.f32 %v1419_v47  ;;  %v1012_v54 = vpop.f32.mrf.mxu0 }
 0x297   : > { %v1240_v55 = vpop.f32.mrf.mxu1  ;;  %v2084_v56 = vpop.eup %2083  ;;  %v1468_v57 = vadd.f32 1.0, %v2082_v53  ;;  %v1421_v58 = vmul.f32 1.442695, %v1376_v51  ;;  %v1345_v59 = vadd.f32 %v2909_v43, %v1236_v52 }
 0x298   : > { %1582 = vperm.xlu1 %2052, %v2084_v56   ;;  %v1015_v60 = vpop.f32.mrf.mxu0 }
 0x299   : > { %v1242_v61 = vpop.f32.mrf.mxu1  ;;  %2097 = vrcp.f32 %v1468_v57  ;;  %v1377_v62 = vsub.f32 0.0, %v1345_v59  ;;  %v1241_v63 = vadd.f32 %v1240_v55, %v1015_v60 }
 0x29a   : > { %v2086_v0 = vpop.eup %2085  ;;  %2099 = vpow2.f32 %v1421_v58  ;;  %v1017_v1 = vpop.f32.mrf.mxu0 }
 0x29b   : > { %v1245_v2 = vpop.f32.mrf.mxu1  ;;  %v2088_v3 = vpop.eup %2087  ;;  %v1469_v4 = vadd.f32 1.0, %v2086_v0  ;;  %v1423_v5 = vmul.f32 1.442695, %v1377_v62  ;;  %v1346_v6 = vadd.f32 %v2909_v43, %v1241_v63 }
 0x29c   : > { %1587 = vperm.xlu1 %2052, %v2088_v3   ;;  %v1020_v7 = vpop.f32.mrf.mxu0 }
 0x29d   : > { %v1247_v8 = vpop.f32.mrf.mxu1  ;;  %2101 = vrcp.f32 %v1469_v4  ;;  %v1378_v9 = vsub.f32 0.0, %v1346_v6  ;;  %v1246_v10 = vadd.f32 %v1245_v2, %v1020_v7 }
 0x29e   : > { %v2090_v11 = vpop.eup %2089  ;;  %2103 = vpow2.f32 %v1423_v5  ;;  %v1022_v12 = vpop.f32.mrf.mxu0 }
 0x29f   : > { %v1250_v13 = vpop.f32.mrf.mxu1  ;;  %v2092_v14 = vpop.eup %2091  ;;  %v1470_v15 = vadd.f32 1.0, %v2090_v11  ;;  %v1425_v16 = vmul.f32 1.442695, %v1378_v9  ;;  %v1347_v17 = vadd.f32 %v2909_v43, %v1246_v10 }
 0x2a0   : > { %1592 = vperm.xlu1 %2052, %v2092_v14   ;;  %v1025_v18 = vpop.f32.mrf.mxu0 }
 0x2a1   : > { %v1252_v19 = vpop.f32.mrf.mxu1  ;;  %2105 = vrcp.f32 %v1470_v15  ;;  %v1379_v20 = vsub.f32 0.0, %v1347_v17  ;;  %v1251_v22 = vadd.f32 %v1250_v13, %v1025_v18 }
 0x2a2   : > { %v2094_v23 = vpop.eup %2093  ;;  %2107 = vpow2.f32 %v1425_v16  ;;  %v1027_v24 = vpop.f32.mrf.mxu0 }
 0x2a3   : > { %v1255_v25 = vpop.f32.mrf.mxu1  ;;  %v2096_v26 = vpop.eup %2095  ;;  %v1427_v27 = vmul.f32 1.442695, %v1379_v20  ;;  %v1348_v28 = vadd.f32 %v2909_v43, %v1251_v22 }
 0x2a4   : > { %v1471_v29 = vadd.f32 1.0, %v2096_v26  ;;  %1597 = vperm.xlu1 %2052, %v2094_v23   ;;  %v1030_v30 = vpop.f32.mrf.mxu0 }
 0x2a5   : > { %v1257_v31 = vpop.f32.mrf.mxu1  ;;  %2109 = vpow2.f32 %v1427_v27  ;;  %v1380_v32 = vsub.f32 0.0, %v1348_v28  ;;  %v1256_v33 = vadd.f32 %v1255_v25, %v1030_v30 }
 0x2a6   : > { %v2098_v34 = vpop.eup %2097  ;;  %2111 = vrcp.f32 %v1471_v29  ;;  %v1032_v35 = vpop.f32.mrf.mxu0 }
 0x2a7   : > { %v1260_v36 = vpop.f32.mrf.mxu1  ;;  %v2100_v37 = vpop.eup %2099  ;;  %v1429_v38 = vmul.f32 1.442695, %v1380_v32  ;;  %v1349_v39 = vadd.f32 %v2909_v43, %v1256_v33  ;;  %1602 = vperm.xlu0 %2051, %v2098_v34  }
 0x2a8   : > { %v1472_v40 = vadd.f32 1.0, %v2100_v37  ;;  %v1035_v41 = vpop.f32.mrf.mxu0 }
 0x2a9   : > { %v1262_v42 = vpop.f32.mrf.mxu1  ;;  %2113 = vpow2.f32 %v1429_v38  ;;  %v1381_v44 = vsub.f32 0.0, %v1349_v39  ;;  %v1261_v21 = vadd.f32 %v1260_v36, %v1035_v41 }
 0x2aa   : > { %v2102_v45 = vpop.eup %2101  ;;  %2115 = vrcp.f32 %v1472_v40  ;;  %v1037_v46 = vpop.f32.mrf.mxu0 }
 0x2ab   : > { %v1265_v47 = vpop.f32.mrf.mxu1  ;;  %v2104_v48 = vpop.eup %2103  ;;  %v1431_v49 = vmul.f32 1.442695, %v1381_v44  ;;  %v1350_v50 = vadd.f32 %v2909_v43, %v1261_v21  ;;  %1607 = vperm.xlu1 %2052, %v2102_v45  }
 0x2ac   : > { %v1473_v51 = vadd.f32 1.0, %v2104_v48  ;;  %v1040_v52 = vpop.f32.mrf.mxu0 }
 0x2ad   : > { %v1267_v53 = vpop.f32.mrf.mxu1  ;;  %2117 = vpow2.f32 %v1431_v49  ;;  %v1382_v54 = vsub.f32 0.0, %v1350_v50  ;;  %v1266_v55 = vadd.f32 %v1265_v47, %v1040_v52 }
 0x2ae   : > { %v2106_v56 = vpop.eup %2105  ;;  %2119 = vrcp.f32 %v1473_v51  ;;  %v1042_v57 = vpop.f32.mrf.mxu0 }
 0x2af   : > { %v1270_v58 = vpop.f32.mrf.mxu1  ;;  %v2108_v59 = vpop.eup %2107  ;;  %v1433_v60 = vmul.f32 1.442695, %v1382_v54  ;;  %v1351_v61 = vadd.f32 %v2909_v43, %v1266_v55  ;;  %1612 = vperm.xlu0 %2051, %v2106_v56  }
 0x2b0   : > { %v1474_v62 = vadd.f32 1.0, %v2108_v59  ;;  %v1045_v63 = vpop.f32.mrf.mxu0 }
 0x2b1   : > { %v1272_v0 = vpop.f32.mrf.mxu1  ;;  %2121 = vpow2.f32 %v1433_v60  ;;  %v1383_v1 = vsub.f32 0.0, %v1351_v61  ;;  %v1271_v2 = vadd.f32 %v1270_v58, %v1045_v63 }
 0x2b2   : > { %v2110_v3 = vpop.eup %2109  ;;  %2123 = vrcp.f32 %v1474_v62  ;;  %v1047_v4 = vpop.f32.mrf.mxu0 }
 0x2b3   : > { %v1275_v5 = vpop.f32.mrf.mxu1  ;;  %v2112_v6 = vpop.eup %2111  ;;  %v1475_v7 = vadd.f32 1.0, %v2110_v3  ;;  %v1435_v8 = vmul.f32 1.442695, %v1383_v1  ;;  %v1352_v9 = vadd.f32 %v2909_v43, %v1271_v2 }
 0x2b4   : > { %1617 = vperm.xlu1 %2052, %v2112_v6   ;;  %v1050_v10 = vpop.f32.mrf.mxu0 }
 0x2b5   : > { %v1277_v11 = vpop.f32.mrf.mxu1  ;;  %2125 = vrcp.f32 %v1475_v7  ;;  %v1384_v12 = vsub.f32 0.0, %v1352_v9  ;;  %v1276_v13 = vadd.f32 %v1275_v5, %v1050_v10 }
 0x2b6   : > { %v2114_v14 = vpop.eup %2113  ;;  %2127 = vpow2.f32 %v1435_v8  ;;  %v1052_v15 = vpop.f32.mrf.mxu0 }
 0x2b7   : > { %v1280_v16 = vpop.f32.mrf.mxu1  ;;  %v2116_v17 = vpop.eup %2115  ;;  %v1476_v18 = vadd.f32 1.0, %v2114_v14  ;;  %v1437_v19 = vmul.f32 1.442695, %v1384_v12  ;;  %v1353_v20 = vadd.f32 %v2909_v43, %v1276_v13 }
 0x2b8   : > { %1622 = vperm.xlu0 %2051, %v2116_v17   ;;  %v1055_v22 = vpop.f32.mrf.mxu0 }
 0x2b9   : > { %v1282_v23 = vpop.f32.mrf.mxu1  ;;  %2129 = vrcp.f32 %v1476_v18  ;;  %v1385_v24 = vsub.f32 0.0, %v1353_v20  ;;  %v1281_v25 = vadd.f32 %v1280_v16, %v1055_v22 }
 0x2ba   : > { %v2118_v26 = vpop.eup %2117  ;;  %2131 = vpow2.f32 %v1437_v19  ;;  %v1057_v27 = vpop.f32.mrf.mxu0 }
 0x2bb   : > { %v1285_v28 = vpop.f32.mrf.mxu1  ;;  %v2120_v29 = vpop.eup %2119  ;;  %v1477_v30 = vadd.f32 1.0, %v2118_v26  ;;  %v1439_v31 = vmul.f32 1.442695, %v1385_v24  ;;  %v1354_v32 = vadd.f32 %v2909_v43, %v1281_v25 }
 0x2bc   : > { %1627 = vperm.xlu1 %2052, %v2120_v29   ;;  %v1060_v33 = vpop.f32.mrf.mxu0 }
 0x2bd   : > { %v1287_v34 = vpop.f32.mrf.mxu1  ;;  %2133 = vrcp.f32 %v1477_v30  ;;  %v1386_v35 = vsub.f32 0.0, %v1354_v32  ;;  %v1286_v36 = vadd.f32 %v1285_v28, %v1060_v33 }
 0x2be   : > { %v2122_v37 = vpop.eup %2121  ;;  %2135 = vpow2.f32 %v1439_v31  ;;  %v1062_v38 = vpop.f32.mrf.mxu0 }
 0x2bf   : > { %v1290_v39 = vpop.f32.mrf.mxu1  ;;  %v2124_v40 = vpop.eup %2123  ;;  %v1478_v41 = vadd.f32 1.0, %v2122_v37  ;;  %v1441_v42 = vmul.f32 1.442695, %v1386_v35  ;;  %v1355_v44 = vadd.f32 %v2909_v43, %v1286_v36 }
 0x2c0   : > { %1632 = vperm.xlu0 %2051, %v2124_v40   ;;  %v1065_v21 = vpop.f32.mrf.mxu0 }
 0x2c1   : > { %v1292_v45 = vpop.f32.mrf.mxu1  ;;  %2137 = vrcp.f32 %v1478_v41  ;;  %v1387_v46 = vsub.f32 0.0, %v1355_v44  ;;  %v1291_v47 = vadd.f32 %v1290_v39, %v1065_v21 }
 0x2c2   : > { %v2126_v48 = vpop.eup %2125  ;;  %2139 = vpow2.f32 %v1441_v42  ;;  %v1067_v49 = vpop.f32.mrf.mxu0 }
 0x2c3   : > { %v1295_v50 = vpop.f32.mrf.mxu1  ;;  %v2128_v51 = vpop.eup %2127  ;;  %v1443_v52 = vmul.f32 1.442695, %v1387_v46  ;;  %v1356_v53 = vadd.f32 %v2909_v43, %v1291_v47  ;;  %1637 = vperm.xlu1 %2052, %v2126_v48  }
 0x2c4   : > { %v1479_v54 = vadd.f32 1.0, %v2128_v51  ;;  %v1070_v55 = vpop.f32.mrf.mxu0 }
 0x2c5   : > { %v1297_v56 = vpop.f32.mrf.mxu1  ;;  %2141 = vpow2.f32 %v1443_v52  ;;  %v1388_v57 = vsub.f32 0.0, %v1356_v53  ;;  %v1296_v58 = vadd.f32 %v1295_v50, %v1070_v55 }
 0x2c6   : > { %v2130_v59 = vpop.eup %2129  ;;  %2143 = vrcp.f32 %v1479_v54  ;;  %v1072_v60 = vpop.f32.mrf.mxu0 }
 0x2c7   : > { %v1300_v61 = vpop.f32.mrf.mxu1  ;;  %v2132_v62 = vpop.eup %2131  ;;  %v1445_v63 = vmul.f32 1.442695, %v1388_v57  ;;  %v1357_v0 = vadd.f32 %v2909_v43, %v1296_v58  ;;  %1642 = vperm.xlu0 %2051, %v2130_v59  }
 0x2c8   : > { %v1480_v1 = vadd.f32 1.0, %v2132_v62  ;;  %v1075_v2 = vpop.f32.mrf.mxu0 }
 0x2c9   : > { %v1302_v3 = vpop.f32.mrf.mxu1  ;;  %2145 = vpow2.f32 %v1445_v63  ;;  %v1389_v4 = vsub.f32 0.0, %v1357_v0  ;;  %v1301_v5 = vadd.f32 %v1300_v61, %v1075_v2 }
 0x2ca   : > { %v2134_v6 = vpop.eup %2133  ;;  %2147 = vrcp.f32 %v1480_v1  ;;  %v1077_v7 = vpop.f32.mrf.mxu0 }
 0x2cb   : > { %v1305_v8 = vpop.f32.mrf.mxu1  ;;  %v2136_v9 = vpop.eup %2135  ;;  %v1447_v10 = vmul.f32 1.442695, %v1389_v4  ;;  %v1358_v11 = vadd.f32 %v2909_v43, %v1301_v5  ;;  %1647 = vperm.xlu1 %2052, %v2134_v6  }
 0x2cc   : > { %v1481_v12 = vadd.f32 1.0, %v2136_v9  ;;  %v1080_v13 = vpop.f32.mrf.mxu0 }
 0x2cd   : > { %v1307_v14 = vpop.f32.mrf.mxu1  ;;  %2149 = vpow2.f32 %v1447_v10  ;;  %v1390_v15 = vsub.f32 0.0, %v1358_v11  ;;  %v1306_v16 = vadd.f32 %v1305_v8, %v1080_v13 }
 0x2ce   : > { %v2138_v17 = vpop.eup %2137  ;;  %2151 = vrcp.f32 %v1481_v12  ;;  %v1082_v18 = vpop.f32.mrf.mxu0  ;;  %v1973_v12 = vld [vmem:[%s2267_s21 + $0x100] sm:$0xff] }
 0x2cf   : > { %v1310_v19 = vpop.f32.mrf.mxu1  ;;  %v2140_v20 = vpop.eup %2139  ;;  %v1449_v22 = vmul.f32 1.442695, %v1390_v15  ;;  %v1359_v23 = vadd.f32 %v2909_v43, %v1306_v16  ;;  %1652 = vperm.xlu0 %2051, %v2138_v17   ;;  %v2181_v15 = vld [vmem:[%s2267_s21] sm:$0xff]  ;;  %v1974_v18 = vld [vmem:[%s2267_s21 + $0x108] sm:$0xff] }
 0x2d0   : > { %v1482_v24 = vadd.f32 1.0, %v2140_v20  ;;  %v1085_v25 = vpop.f32.mrf.mxu0  ;;  %v2182_v20 = vld [vmem:[%s2267_s21 + $0x8] sm:$0xff] }
 0x2d1   : > { %v1312_v26 = vpop.f32.mrf.mxu1  ;;  %2153 = vpow2.f32 %v1449_v22  ;;  %v1391_v27 = vsub.f32 0.0, %v1359_v23  ;;  %v1311_v28 = vadd.f32 %v1310_v19, %v1085_v25 }
 0x2d2   : > { %v2142_v29 = vpop.eup %2141  ;;  %2155 = vrcp.f32 %v1482_v24  ;;  %v1087_v30 = vpop.f32.mrf.mxu0  ;;  %v1975_v24 = vld [vmem:[%s2267_s21 + $0x110] sm:$0xff] }
 0x2d3   : > { %v1315_v31 = vpop.f32.mrf.mxu1  ;;  %v2144_v32 = vpop.eup %2143  ;;  %v1483_v33 = vadd.f32 1.0, %v2142_v29  ;;  %v1451_v34 = vmul.f32 1.442695, %v1391_v27  ;;  %v1360_v35 = vadd.f32 %v2909_v43, %v1311_v28  ;;  %v2183_v26 = vld [vmem:[%s2267_s21 + $0x10] sm:$0xff]  ;;  %v1976_v29 = vld [vmem:[%s2267_s21 + $0x118] sm:$0xff] }
 0x2d4   : > { %1657 = vperm.xlu1 %2052, %v2144_v32   ;;  %v1090_v36 = vpop.f32.mrf.mxu0 }
 0x2d5   : > { %v1317_v37 = vpop.f32.mrf.mxu1  ;;  %2157 = vrcp.f32 %v1483_v33  ;;  %v1392_v38 = vsub.f32 0.0, %v1360_v35  ;;  %v1316_v39 = vadd.f32 %v1315_v31, %v1090_v36  ;;  %v2184_v31 = vld [vmem:[%s2267_s21 + $0x18] sm:$0xff]  ;;  %v2185_v36 = vld [vmem:[%s2267_s21 + $0x20] sm:$0xff] }
 0x2d6   : > { %v2146_v40 = vpop.eup %2145  ;;  %2159 = vpow2.f32 %v1451_v34  ;;  %v1092_v41 = vpop.f32.mrf.mxu0  ;;  %v1977_v34 = vld [vmem:[%s2267_s21 + $0x120] sm:$0xff] }
 0x2d7   : > { %v1320_v42 = vpop.f32.mrf.mxu1  ;;  %v2148_v44 = vpop.eup %2147  ;;  %v1484_v21 = vadd.f32 1.0, %v2146_v40  ;;  %v1453_v45 = vmul.f32 1.442695, %v1392_v38  ;;  %v1361_v46 = vadd.f32 %v2909_v43, %v1316_v39  ;;  %v1978_v39 = vld [vmem:[%s2267_s21 + $0x128] sm:$0xff] }
 0x2d8   : > { %1662 = vperm.xlu0 %2051, %v2148_v44   ;;  %v1095_v47 = vpop.f32.mrf.mxu0  ;;  %v2186_v41 = vld [vmem:[%s2267_s21 + $0x28] sm:$0xff] }
 0x2d9   : > { %v1322_v48 = vpop.f32.mrf.mxu1  ;;  %2161 = vrcp.f32 %v1484_v21  ;;  %v1393_v49 = vsub.f32 0.0, %v1361_v46  ;;  %v1321_v50 = vadd.f32 %v1320_v42, %v1095_v47  ;;  %v1979_v21 = vld [vmem:[%s2267_s21 + $0x130] sm:$0xff] }
 0x2da   : > { %v2150_v51 = vpop.eup %2149  ;;  %2163 = vpow2.f32 %v1453_v45  ;;  %v1097_v52 = vpop.f32.mrf.mxu0  ;;  %v2187_v46 = vld [vmem:[%s2267_s21 + $0x30] sm:$0xff] }
 0x2db   : > { %v2152_v53 = vpop.eup %2151  ;;  %v1485_v54 = vadd.f32 1.0, %v2150_v51  ;;  %v1455_v55 = vmul.f32 1.442695, %v1393_v49  ;;  %v1362_v56 = vadd.f32 %v2909_v43, %v1321_v50  ;;  %v1980_v49 = vld [vmem:[%s2267_s21 + $0x138] sm:$0xff] }
 0x2dc   : > { %1667 = vperm.xlu1 %2052, %v2152_v53   ;;  %v2188_v51 = vld [vmem:[%s2267_s21 + $0x38] sm:$0xff] }
 0x2dd   : > { %2165 = vrcp.f32 %v1485_v54  ;;  %v1394_v57 = vsub.f32 0.0, %v1362_v56  ;;  %v1981_v54 = vld [vmem:[%s2267_s21 + $0x140] sm:$0xff] }
 0x2de   : > { %v2154_v58 = vpop.eup %2153  ;;  %2167 = vpow2.f32 %v1455_v55  ;;  %v2189_v56 = vld [vmem:[%s2267_s21 + $0x40] sm:$0xff] }
 0x2df   : > { %v2156_v59 = vpop.eup %2155  ;;  %v1486_v60 = vadd.f32 1.0, %v2154_v58  ;;  %v1457_v61 = vmul.f32 1.442695, %v1394_v57 }
 0x2e0   : > { %1672 = vperm.xlu0 %2051, %v2156_v59   ;;  %v1982_v59 = vld [vmem:[%s2267_s21 + $0x148] sm:$0xff] }
 0x2e1   : > { %2169 = vrcp.f32 %v1486_v60 }
 0x2e2   : > { %v2158_v62 = vpop.eup %2157  ;;  %2171 = vpow2.f32 %v1457_v61  ;;  %v2190_v61 = vld [vmem:[%s2267_s21 + $0x48] sm:$0xff] }
 0x2e3   : > { %v2160_v63 = vpop.eup %2159  ;;  %1677 = vperm.xlu1 %2052, %v2158_v62  }
 0x2e4   : > { %v1487_v0 = vadd.f32 1.0, %v2160_v63 }
 0x2e6   : > { %v2162_v1 = vpop.eup %2161  ;;  %2173 = vrcp.f32 %v1487_v0  ;;  %v1983_v0 = vld [vmem:[%s2267_s21 + $0x150] sm:$0xff] }
 0x2e7   : > { %v2164_v2 = vpop.eup %2163  ;;  %1682 = vperm.xlu0 %2051, %v2162_v1  }
 0x2e8   : > { %v1488_v43 = vadd.f32 1.0, %v2164_v2  ;;  %v2191_v2 = vld [vmem:[%s2267_s21 + $0x50] sm:$0xff] }
 0x2ea   : > { %v2166_v3 = vpop.eup %2165  ;;  %2175 = vrcp.f32 %v1488_v43 }
 0x2eb   : > { %v2168_v4 = vpop.eup %2167  ;;  %1687 = vperm.xlu1 %2052, %v2166_v3  }
 0x2ec   : > { %v1489_v5 = vadd.f32 1.0, %v2168_v4  ;;  %v1984_v4 = vld [vmem:[%s2267_s21 + $0x158] sm:$0xff] }
 0x2ee   : > { %v2170_v6 = vpop.eup %2169  ;;  %2177 = vrcp.f32 %v1489_v5 }
 0x2ef   : > { %v2172_v7 = vpop.eup %2171  ;;  %1692 = vperm.xlu0 %2051, %v2170_v6   ;;  %v2192_v6 = vld [vmem:[%s2267_s21 + $0x58] sm:$0xff] }
 0x2f0   : > { %v1490_v8 = vadd.f32 1.0, %v2172_v7 }
 0x2f2   : > { %2179 = vrcp.f32 %v1490_v8 }
 0x2f3   : > { %v2174_v9 = vpop.eup %2173 }
 0x2f4   : > { %1697 = vperm.xlu1 %2052, %v2174_v9   ;;  %v1985_v9 = vld [vmem:[%s2267_s21 + $0x160] sm:$0xff] }
 0x2f7   : > { %v2176_v10 = vpop.eup %2175 }
 0x2f8   : > { %1702 = vperm.xlu0 %2051, %v2176_v10  }
 0x2fb   : > { %v2178_v11 = vpop.eup %2177 }
 0x2fc   : > { %1707 = vperm.xlu1 %2052, %v2178_v11   ;;  %v2193_v11 = vld [vmem:[%s2267_s21 + $0x60] sm:$0xff] }
 0x2fe   : > { %v1558_v13 = vpop.permute.xlu0 %1557 }
 0x2ff   : > { %v2180_v14 = vpop.eup %2179  ;;  %v1715_v16 = vmul.f32 %v2181_v15, %v1558_v13  ;;  %v1811_v17 = vmul.f32 %v1973_v12, %v1558_v13 }
 0x300   : > { %1712 = vperm.xlu0 %2051, %v2180_v14   ;;  %v1986_v14 = vld [vmem:[%s2267_s21 + $0x168] sm:$0xff] }
 0x301   : > { %1747 = vst.msk [vmem:[%s2949_s27] sm:$0xff] %vm232_vm0, %v1715_v16  ;;  %2005 = vst.msk [vmem:[%s2949_s27 + $0x100] sm:$0xff] %vm232_vm0, %v1811_v17  ;;  %v2194_v16 = vld [vmem:[%s2267_s21 + $0x68] sm:$0xff] }
 0x302   : > { %v1563_v19 = vpop.permute.xlu1 %1562 }
 0x303   : > { %v1716_v22 = vmul.f32 %v2182_v20, %v1563_v19  ;;  %v1812_v23 = vmul.f32 %v1974_v18, %v1563_v19  ;;  %v1987_v19 = vld [vmem:[%s2267_s21 + $0x170] sm:$0xff] }
 0x305   : > { %1748 = vst.msk [vmem:[%s2949_s27 + $0x8] sm:$0xff] %vm232_vm0, %v1716_v22  ;;  %2006 = vst.msk [vmem:[%s2949_s27 + $0x108] sm:$0xff] %vm232_vm0, %v1812_v23  ;;  %v2195_v22 = vld [vmem:[%s2267_s21 + $0x70] sm:$0xff] }
 0x306   : > { %v1568_v25 = vpop.permute.xlu1 %1567 }
 0x307   : > { %v1717_v27 = vmul.f32 %v2183_v26, %v1568_v25  ;;  %v1813_v28 = vmul.f32 %v1975_v24, %v1568_v25  ;;  %v1988_v25 = vld [vmem:[%s2267_s21 + $0x178] sm:$0xff] }
 0x309   : > { %1749 = vst.msk [vmem:[%s2949_s27 + $0x10] sm:$0xff] %vm232_vm0, %v1717_v27  ;;  %2007 = vst.msk [vmem:[%s2949_s27 + $0x110] sm:$0xff] %vm232_vm0, %v1813_v28  ;;  %v2196_v27 = vld [vmem:[%s2267_s21 + $0x78] sm:$0xff] }
 0x30a   : > { %v1573_v30 = vpop.permute.xlu1 %1572 }
 0x30b   : > { %v1718_v32 = vmul.f32 %v2184_v31, %v1573_v30  ;;  %v1814_v33 = vmul.f32 %v1976_v29, %v1573_v30  ;;  %v1989_v30 = vld [vmem:[%s2267_s21 + $0x180] sm:$0xff] }
 0x30d   : > { %1750 = vst.msk [vmem:[%s2949_s27 + $0x18] sm:$0xff] %vm232_vm0, %v1718_v32  ;;  %2008 = vst.msk [vmem:[%s2949_s27 + $0x118] sm:$0xff] %vm232_vm0, %v1814_v33  ;;  %v2197_v32 = vld [vmem:[%s2267_s21 + $0x80] sm:$0xff] }
 0x30f   : > { %v1578_v35 = vpop.permute.xlu1 %1577 }
 0x310   : > { %v1719_v37 = vmul.f32 %v2185_v36, %v1578_v35  ;;  %v1815_v38 = vmul.f32 %v1977_v34, %v1578_v35  ;;  %v1990_v35 = vld [vmem:[%s2267_s21 + $0x188] sm:$0xff] }
 0x312   : > { %1751 = vst.msk [vmem:[%s2949_s27 + $0x20] sm:$0xff] %vm232_vm0, %v1719_v37  ;;  %2009 = vst.msk [vmem:[%s2949_s27 + $0x120] sm:$0xff] %vm232_vm0, %v1815_v38  ;;  %v2198_v37 = vld [vmem:[%s2267_s21 + $0x88] sm:$0xff] }
 0x313   : > { %v1583_v40 = vpop.permute.xlu1 %1582 }
 0x314   : > { %v1720_v42 = vmul.f32 %v2186_v41, %v1583_v40  ;;  %v1816_v44 = vmul.f32 %v1978_v39, %v1583_v40  ;;  %v1991_v40 = vld [vmem:[%s2267_s21 + $0x190] sm:$0xff] }
 0x316   : > { %1752 = vst.msk [vmem:[%s2949_s27 + $0x28] sm:$0xff] %vm232_vm0, %v1720_v42  ;;  %2010 = vst.msk [vmem:[%s2949_s27 + $0x128] sm:$0xff] %vm232_vm0, %v1816_v44  ;;  %v2199_v42 = vld [vmem:[%s2267_s21 + $0x90] sm:$0xff] }
 0x317   : > { %v1588_v45 = vpop.permute.xlu1 %1587 }
 0x318   : > { %v1721_v47 = vmul.f32 %v2187_v46, %v1588_v45  ;;  %v1817_v48 = vmul.f32 %v1979_v21, %v1588_v45  ;;  %v1992_v45 = vld [vmem:[%s2267_s21 + $0x198] sm:$0xff] }
 0x31a   : > { %1753 = vst.msk [vmem:[%s2949_s27 + $0x30] sm:$0xff] %vm232_vm0, %v1721_v47  ;;  %2011 = vst.msk [vmem:[%s2949_s27 + $0x130] sm:$0xff] %vm232_vm0, %v1817_v48  ;;  %v2200_v47 = vld [vmem:[%s2267_s21 + $0x98] sm:$0xff] }
 0x31b   : > { %v1593_v50 = vpop.permute.xlu1 %1592 }
 0x31c   : > { %v1722_v52 = vmul.f32 %v2188_v51, %v1593_v50  ;;  %v1818_v53 = vmul.f32 %v1980_v49, %v1593_v50  ;;  %v1993_v50 = vld [vmem:[%s2267_s21 + $0x1a0] sm:$0xff] }
 0x31e   : > { %1754 = vst.msk [vmem:[%s2949_s27 + $0x38] sm:$0xff] %vm232_vm0, %v1722_v52  ;;  %2012 = vst.msk [vmem:[%s2949_s27 + $0x138] sm:$0xff] %vm232_vm0, %v1818_v53  ;;  %v2201_v52 = vld [vmem:[%s2267_s21 + $0xa0] sm:$0xff] }
 0x31f   : > { %v1598_v55 = vpop.permute.xlu1 %1597 }
 0x320   : > { %v1723_v57 = vmul.f32 %v2189_v56, %v1598_v55  ;;  %v1819_v58 = vmul.f32 %v1981_v54, %v1598_v55  ;;  %v1994_v55 = vld [vmem:[%s2267_s21 + $0x1a8] sm:$0xff] }
 0x322   : > { %1755 = vst.msk [vmem:[%s2949_s27 + $0x40] sm:$0xff] %vm232_vm0, %v1723_v57  ;;  %2013 = vst.msk [vmem:[%s2949_s27 + $0x140] sm:$0xff] %vm232_vm0, %v1819_v58  ;;  %v1603_v60 = vpop.permute.xlu0 %1602  ;;  %v2202_v57 = vld [vmem:[%s2267_s21 + $0xa8] sm:$0xff] }
 0x323   : > { %v1724_v62 = vmul.f32 %v2190_v61, %v1603_v60  ;;  %v1820_v63 = vmul.f32 %v1982_v59, %v1603_v60  ;;  %v1995_v60 = vld [vmem:[%s2267_s21 + $0x1b0] sm:$0xff] }
 0x325   : > { %1756 = vst.msk [vmem:[%s2949_s27 + $0x48] sm:$0xff] %vm232_vm0, %v1724_v62  ;;  %2014 = vst.msk [vmem:[%s2949_s27 + $0x148] sm:$0xff] %vm232_vm0, %v1820_v63  ;;  %v2203_v62 = vld [vmem:[%s2267_s21 + $0xb0] sm:$0xff] }
 0x326   : > { %v1608_v1 = vpop.permute.xlu1 %1607 }
 0x327   : > { %v1725_v43 = vmul.f32 %v2191_v2, %v1608_v1  ;;  %v1821_v3 = vmul.f32 %v1983_v0, %v1608_v1  ;;  %v1996_v1 = vld [vmem:[%s2267_s21 + $0x1b8] sm:$0xff] }
 0x329   : > { %1757 = vst.msk [vmem:[%s2949_s27 + $0x50] sm:$0xff] %vm232_vm0, %v1725_v43  ;;  %2015 = vst.msk [vmem:[%s2949_s27 + $0x150] sm:$0xff] %vm232_vm0, %v1821_v3  ;;  %v2204_v43 = vld [vmem:[%s2267_s21 + $0xb8] sm:$0xff] }
 0x32a   : > { %v1613_v5 = vpop.permute.xlu0 %1612 }
 0x32b   : > { %v1726_v7 = vmul.f32 %v2192_v6, %v1613_v5  ;;  %v1822_v8 = vmul.f32 %v1984_v4, %v1613_v5  ;;  %v1997_v5 = vld [vmem:[%s2267_s21 + $0x1c0] sm:$0xff] }
 0x32d   : > { %1758 = vst.msk [vmem:[%s2949_s27 + $0x58] sm:$0xff] %vm232_vm0, %v1726_v7  ;;  %2016 = vst.msk [vmem:[%s2949_s27 + $0x158] sm:$0xff] %vm232_vm0, %v1822_v8  ;;  %v2205_v7 = vld [vmem:[%s2267_s21 + $0xc0] sm:$0xff] }
 0x32f   : > { %v1618_v10 = vpop.permute.xlu1 %1617 }
 0x330   : > { %v1727_v12 = vmul.f32 %v2193_v11, %v1618_v10  ;;  %v1823_v13 = vmul.f32 %v1985_v9, %v1618_v10  ;;  %v1998_v10 = vld [vmem:[%s2267_s21 + $0x1c8] sm:$0xff] }
 0x332   : > { %1759 = vst.msk [vmem:[%s2949_s27 + $0x60] sm:$0xff] %vm232_vm0, %v1727_v12  ;;  %2017 = vst.msk [vmem:[%s2949_s27 + $0x160] sm:$0xff] %vm232_vm0, %v1823_v13  ;;  %v2206_v12 = vld [vmem:[%s2267_s21 + $0xc8] sm:$0xff] }
 0x333   : > { %v1623_v15 = vpop.permute.xlu0 %1622 }
 0x334   : > { %v1728_v17 = vmul.f32 %v2194_v16, %v1623_v15  ;;  %v1824_v18 = vmul.f32 %v1986_v14, %v1623_v15  ;;  %v1999_v15 = vld [vmem:[%s2267_s21 + $0x1d0] sm:$0xff] }
 0x336   : > { %1760 = vst.msk [vmem:[%s2949_s27 + $0x68] sm:$0xff] %vm232_vm0, %v1728_v17  ;;  %2018 = vst.msk [vmem:[%s2949_s27 + $0x168] sm:$0xff] %vm232_vm0, %v1824_v18  ;;  %v2207_v17 = vld [vmem:[%s2267_s21 + $0xd0] sm:$0xff] }
 0x337   : > { %v1628_v20 = vpop.permute.xlu1 %1627 }
 0x338   : > { %v1729_v23 = vmul.f32 %v2195_v22, %v1628_v20  ;;  %v1825_v24 = vmul.f32 %v1987_v19, %v1628_v20  ;;  %v2000_v20 = vld [vmem:[%s2267_s21 + $0x1d8] sm:$0xff] }
 0x33a   : > { %1761 = vst.msk [vmem:[%s2949_s27 + $0x70] sm:$0xff] %vm232_vm0, %v1729_v23  ;;  %2019 = vst.msk [vmem:[%s2949_s27 + $0x170] sm:$0xff] %vm232_vm0, %v1825_v24  ;;  %v2208_v23 = vld [vmem:[%s2267_s21 + $0xd8] sm:$0xff] }
 0x33b   : > { %v1633_v26 = vpop.permute.xlu0 %1632 }
 0x33c   : > { %v1730_v28 = vmul.f32 %v2196_v27, %v1633_v26  ;;  %v1826_v29 = vmul.f32 %v1988_v25, %v1633_v26  ;;  %v2001_v26 = vld [vmem:[%s2267_s21 + $0x1e0] sm:$0xff] }
 0x33e   : > { %1762 = vst.msk [vmem:[%s2949_s27 + $0x78] sm:$0xff] %vm232_vm0, %v1730_v28  ;;  %2020 = vst.msk [vmem:[%s2949_s27 + $0x178] sm:$0xff] %vm232_vm0, %v1826_v29  ;;  %v1638_v31 = vpop.permute.xlu1 %1637  ;;  %v2209_v28 = vld [vmem:[%s2267_s21 + $0xe0] sm:$0xff] }
 0x33f   : > { %v1731_v33 = vmul.f32 %v2197_v32, %v1638_v31  ;;  %v1827_v34 = vmul.f32 %v1989_v30, %v1638_v31  ;;  %v2002_v31 = vld [vmem:[%s2267_s21 + $0x1e8] sm:$0xff] }
 0x341   : > { %1763 = vst.msk [vmem:[%s2949_s27 + $0x80] sm:$0xff] %vm232_vm0, %v1731_v33  ;;  %2021 = vst.msk [vmem:[%s2949_s27 + $0x180] sm:$0xff] %vm232_vm0, %v1827_v34  ;;  %v2210_v33 = vld [vmem:[%s2267_s21 + $0xe8] sm:$0xff] }
 0x342   : > { %v1643_v36 = vpop.permute.xlu0 %1642 }
 0x343   : > { %v1732_v38 = vmul.f32 %v2198_v37, %v1643_v36  ;;  %v1828_v39 = vmul.f32 %v1990_v35, %v1643_v36  ;;  %v2003_v36 = vld [vmem:[%s2267_s21 + $0x1f0] sm:$0xff] }
 0x345   : > { %1764 = vst.msk [vmem:[%s2949_s27 + $0x88] sm:$0xff] %vm232_vm0, %v1732_v38  ;;  %2022 = vst.msk [vmem:[%s2949_s27 + $0x188] sm:$0xff] %vm232_vm0, %v1828_v39  ;;  %v2211_v38 = vld [vmem:[%s2267_s21 + $0xf0] sm:$0xff] }
 0x346   : > { %v1648_v41 = vpop.permute.xlu1 %1647 }
 0x347   : > { %v1733_v44 = vmul.f32 %v2199_v42, %v1648_v41  ;;  %v1829_v21 = vmul.f32 %v1991_v40, %v1648_v41  ;;  %v2004_v41 = vld [vmem:[%s2267_s21 + $0x1f8] sm:$0xff] }
 0x349   : > { %1765 = vst.msk [vmem:[%s2949_s27 + $0x90] sm:$0xff] %vm232_vm0, %v1733_v44  ;;  %2023 = vst.msk [vmem:[%s2949_s27 + $0x190] sm:$0xff] %vm232_vm0, %v1829_v21  ;;  %v2212_v44 = vld [vmem:[%s2267_s21 + $0xf8] sm:$0xff] }
 0x34a   : > { %v1653_v46 = vpop.permute.xlu0 %1652 }
 0x34b   : > { %v1734_v48 = vmul.f32 %v2200_v47, %v1653_v46  ;;  %v1830_v49 = vmul.f32 %v1992_v45, %v1653_v46 }
 0x34d   : > { %1766 = vst.msk [vmem:[%s2949_s27 + $0x98] sm:$0xff] %vm232_vm0, %v1734_v48  ;;  %2024 = vst.msk [vmem:[%s2949_s27 + $0x198] sm:$0xff] %vm232_vm0, %v1830_v49 }
 0x34f   : > { %v1658_v51 = vpop.permute.xlu1 %1657 }
 0x350   : > { %v1735_v53 = vmul.f32 %v2201_v52, %v1658_v51  ;;  %v1831_v54 = vmul.f32 %v1993_v50, %v1658_v51 }
 0x352   : > { %1767 = vst.msk [vmem:[%s2949_s27 + $0xa0] sm:$0xff] %vm232_vm0, %v1735_v53  ;;  %2025 = vst.msk [vmem:[%s2949_s27 + $0x1a0] sm:$0xff] %vm232_vm0, %v1831_v54 }
 0x353   : > { %v1663_v56 = vpop.permute.xlu0 %1662 }
 0x354   : > { %v1736_v58 = vmul.f32 %v2202_v57, %v1663_v56  ;;  %v1832_v59 = vmul.f32 %v1994_v55, %v1663_v56 }
 0x356   : > { %1768 = vst.msk [vmem:[%s2949_s27 + $0xa8] sm:$0xff] %vm232_vm0, %v1736_v58  ;;  %2026 = vst.msk [vmem:[%s2949_s27 + $0x1a8] sm:$0xff] %vm232_vm0, %v1832_v59 }
 0x357   : > { %v1668_v61 = vpop.permute.xlu1 %1667 }
 0x358   : > { %v1737_v63 = vmul.f32 %v2203_v62, %v1668_v61  ;;  %v1833_v0 = vmul.f32 %v1995_v60, %v1668_v61 }
 0x35a   : > { %1769 = vst.msk [vmem:[%s2949_s27 + $0xb0] sm:$0xff] %vm232_vm0, %v1737_v63  ;;  %2027 = vst.msk [vmem:[%s2949_s27 + $0x1b0] sm:$0xff] %vm232_vm0, %v1833_v0 }
 0x35b   : > { %v1673_v2 = vpop.permute.xlu0 %1672 }
 0x35c   : > { %v1738_v3 = vmul.f32 %v2204_v43, %v1673_v2  ;;  %v1834_v4 = vmul.f32 %v1996_v1, %v1673_v2 }
 0x35e   : > { %1770 = vst.msk [vmem:[%s2949_s27 + $0xb8] sm:$0xff] %vm232_vm0, %v1738_v3  ;;  %2028 = vst.msk [vmem:[%s2949_s27 + $0x1b8] sm:$0xff] %vm232_vm0, %v1834_v4  ;;  %v1678_v6 = vpop.permute.xlu1 %1677 }
 0x35f   : > { %v1739_v8 = vmul.f32 %v2205_v7, %v1678_v6  ;;  %v1835_v9 = vmul.f32 %v1997_v5, %v1678_v6 }
 0x361   : > { %1771 = vst.msk [vmem:[%s2949_s27 + $0xc0] sm:$0xff] %vm232_vm0, %v1739_v8  ;;  %2029 = vst.msk [vmem:[%s2949_s27 + $0x1c0] sm:$0xff] %vm232_vm0, %v1835_v9 }
 0x362   : > { %v1683_v11 = vpop.permute.xlu0 %1682 }
 0x363   : > { %v1740_v13 = vmul.f32 %v2206_v12, %v1683_v11  ;;  %v1836_v14 = vmul.f32 %v1998_v10, %v1683_v11 }
 0x365   : > { %1772 = vst.msk [vmem:[%s2949_s27 + $0xc8] sm:$0xff] %vm232_vm0, %v1740_v13  ;;  %2030 = vst.msk [vmem:[%s2949_s27 + $0x1c8] sm:$0xff] %vm232_vm0, %v1836_v14 }
 0x366   : > { %v1688_v16 = vpop.permute.xlu1 %1687 }
 0x367   : > { %v1741_v18 = vmul.f32 %v2207_v17, %v1688_v16  ;;  %v1837_v19 = vmul.f32 %v1999_v15, %v1688_v16 }
 0x369   : > { %1773 = vst.msk [vmem:[%s2949_s27 + $0xd0] sm:$0xff] %vm232_vm0, %v1741_v18  ;;  %2031 = vst.msk [vmem:[%s2949_s27 + $0x1d0] sm:$0xff] %vm232_vm0, %v1837_v19 }
 0x36a   : > { %v1693_v22 = vpop.permute.xlu0 %1692 }
 0x36b   : > { %v1742_v24 = vmul.f32 %v2208_v23, %v1693_v22  ;;  %v1838_v25 = vmul.f32 %v2000_v20, %v1693_v22 }
 0x36d   : > { %1774 = vst.msk [vmem:[%s2949_s27 + $0xd8] sm:$0xff] %vm232_vm0, %v1742_v24  ;;  %2032 = vst.msk [vmem:[%s2949_s27 + $0x1d8] sm:$0xff] %vm232_vm0, %v1838_v25 }
 0x36f   : > { %v1698_v27 = vpop.permute.xlu1 %1697 }
 0x370   : > { %v1743_v29 = vmul.f32 %v2209_v28, %v1698_v27  ;;  %v1839_v30 = vmul.f32 %v2001_v26, %v1698_v27 }
 0x372   : > { %1775 = vst.msk [vmem:[%s2949_s27 + $0xe0] sm:$0xff] %vm232_vm0, %v1743_v29  ;;  %2033 = vst.msk [vmem:[%s2949_s27 + $0x1e0] sm:$0xff] %vm232_vm0, %v1839_v30 }
 0x373   : > { %v1703_v32 = vpop.permute.xlu0 %1702 }
 0x374   : > { %v1744_v34 = vmul.f32 %v2210_v33, %v1703_v32  ;;  %v1840_v35 = vmul.f32 %v2002_v31, %v1703_v32 }
 0x376   : > { %1776 = vst.msk [vmem:[%s2949_s27 + $0xe8] sm:$0xff] %vm232_vm0, %v1744_v34  ;;  %2034 = vst.msk [vmem:[%s2949_s27 + $0x1e8] sm:$0xff] %vm232_vm0, %v1840_v35 }
 0x377   : > { %v1708_v37 = vpop.permute.xlu1 %1707 }
 0x378   : > { %v1745_v39 = vmul.f32 %v2211_v38, %v1708_v37  ;;  %v1841_v40 = vmul.f32 %v2003_v36, %v1708_v37 }
 0x37a   : > { %1777 = vst.msk [vmem:[%s2949_s27 + $0xf0] sm:$0xff] %vm232_vm0, %v1745_v39  ;;  %2035 = vst.msk [vmem:[%s2949_s27 + $0x1f0] sm:$0xff] %vm232_vm0, %v1841_v40 }
 0x37b   : > { %v1713_v42 = vpop.permute.xlu0 %1712 }
 0x37c   : > { %v1746_v21 = vmul.f32 %v2212_v44, %v1713_v42  ;;  %v1842_v45 = vmul.f32 %v2004_v41, %v1713_v42 }
 0x37e   : > { %1778 = vst.msk [vmem:[%s2949_s27 + $0xf8] sm:$0xff] %vm232_vm0, %v1746_v21  ;;  %2036 = vst.msk [vmem:[%s2949_s27 + $0x1f8] sm:$0xff] %vm232_vm0, %v1842_v45 }
 0x37f PF: > { %s16_s17 = sadd.s32 1, %s2219_s17  }
 0x380   : > { %p13_p4 = scmp.ge.s32.totalorder %s16_s17, 4  }
 0x382   :  { %15 = sbr.rel (!%p13_p4) target bundleno = 3 (0x3), region = 68 }

</bundles_post_ra>
